<compile_context>
chip_gen: v6e
topology: v6e:2x2x1
jax: 0.10.0
libtpu: 0.0.40
codegen_flags: <defaults>
</compile_context>

<pallas_src>
import jax
import jax.numpy as jnp
from jax import lax
from jax.experimental import pallas as pl
from jax.experimental.pallas import tpu as pltpu


def skip_attention_kernel(p_ref, r_ref, wh_ref, bh_ref, wlg_ref, blg_ref, o_ref):
    # p_ref: (Bt, N, Dp) f32   r_ref: (Bt, M, Dr) bf16
    bt, n, dp = p_ref.shape
    _, m, dr = r_ref.shape
    dk = wh_ref.shape[1]

    # --- projections on the MXU: bf16 operands, f32 accumulation, f32 bias add.
    #     Leading dims folded so the matmuls are plain 2-D GEMMs (free reshape:
    #     minor dim unchanged). ---
    p_bf = p_ref[...].astype(jnp.bfloat16)                         # (Bt, N, Dp)
    h = (jnp.dot(p_bf.reshape(bt * n, dp), wh_ref[...],
                 preferred_element_type=jnp.float32) + bh_ref[...]
         ).reshape(bt, n, dk)                                      # (Bt, N, Dk) f32

    # Fused M_l / M_g: one r @ [W_l | W_g] pass, then lane-aligned slices.
    lg = (jnp.dot(r_ref[...].reshape(bt * m, dr), wlg_ref[...],
                  preferred_element_type=jnp.float32) + blg_ref[...]
          ).reshape(bt, m, dk + dp)                                # (Bt, M, Dk+Dp)
    l_bf = lg[:, :, :dk].astype(jnp.bfloat16)                      # (Bt, M, Dk)
    g_bf = lg[:, :, dk:].astype(jnp.bfloat16)                      # (Bt, M, Dp)

    # --- scores = h . l, contracting Dk of both operands, bf16 -> f32 acc ---
    scores = lax.dot_general(
        h.astype(jnp.bfloat16), l_bf,
        dimension_numbers=(((2,), (2,)), ((0,), (0,))),
        preferred_element_type=jnp.float32)                        # (Bt, N, M)

    # --- softmax over M with deferred normalization (all elementwise math f32) ---
    e = jnp.exp(scores - jnp.max(scores, axis=-1, keepdims=True))  # (Bt, N, M)
    denom = jnp.sum(e, axis=-1, keepdims=True)                     # (Bt, N, 1)

    # --- attended = (e @ g) * 1/denom  (normalize the small N*Dp slab, not N*M) ---
    attended = lax.dot_general(
        e.astype(jnp.bfloat16), g_bf,
        dimension_numbers=(((2,), (1,)), ((0,), (0,))),
        preferred_element_type=jnp.float32)                        # (Bt, N, Dp)
    attended = attended * pl.reciprocal(denom, approx=True)

    # Residual: re-read p (already resident in VMEM) instead of keeping it live.
    o_ref[...] = (p_ref[...] + attended).astype(o_ref.dtype)


def _device_vmem_limit_and_megacore():
    """Derive a scoped-VMEM limit from the actual chip and detect multi-TC chips."""
    vmem_physical = 64 * 1024 * 1024            # conservative default (v7x per-TC)
    try:
        vmem_physical = int(pltpu.get_tpu_info().vmem_capacity_bytes)
    except Exception:
        pass
    multi_tc = False
    try:
        kind = jax.devices()[0].device_kind.lower()
        multi_tc = ("v7" in kind) or ("v4" in kind) or ("v5p" in kind)
    except Exception:
        pass
    # Leave headroom under physical VMEM for compiler-internal scratch / spills.
    vmem_limit = min(int(0.6 * vmem_physical), 100 * 1024 * 1024)
    return vmem_limit, multi_tc


def _pick_block_batches(B, N, M, Dp, Dr, Dk, vmem_budget_bytes, multi_tc):
    """Largest batch-block whose estimated working set (f32 + bf16 temporaries,
    double-buffered I/O blocks) fits the budget.  On multi-TensorCore chips keep
    >=2 grid steps so the 'parallel' batch axis can be split across cores; on
    single-TC chips a bigger Bt is strictly better (fewer grid steps, fuller MXU)."""
    f32, bf16 = 4, 2
    per_batch = (
        2 * N * Dp * f32            # p block (f32, double-buffered)
        + 2 * M * Dr * bf16         # r block (bf16, double-buffered)
        + 2 * N * Dp * f32          # out block (f32, double-buffered)
        + N * Dp * bf16             # p bf16 cast
        + N * Dk * (f32 + bf16)     # h (f32 acc + bf16 cast)
        + M * (Dk + Dp) * (f32 + bf16)  # fused l|g acc + bf16 casts
        + 2 * N * M * f32           # scores, e
        + N * M * bf16              # e bf16 cast
        + N * Dp * f32              # attended
    )
    # Weights/biases (counted double-buffered even though we request Buffered(1)).
    fixed = 2 * (Dp * Dk + Dr * (Dk + Dp)) * bf16 + 2 * (Dk + (Dk + Dp)) * f32
    cap = max(1, (vmem_budget_bytes - fixed) // max(per_batch, 1))
    if multi_tc and B > 1:
        cap = min(cap, max(1, B // 2))          # keep >=2 steps for megacore split
    bt = 1
    for d in range(1, B + 1):
        if B % d == 0 and d <= cap:
            bt = d
    return bt


def skip_attention(p, r, wh, bh, wl, bl, wg, bg, *, block_batches=None):
    """p: (B, N, 1, Dp), r: (B, 1, M, Dr)  ->  (B, N, Dp)"""
    B, N, _, Dp = p.shape
    _, _, M, Dr = r.shape
    Dk = wh.shape[1]
    assert Dk % 128 == 0 and Dp % 128 == 0, (
        "This kernel requires Dk and Dp to be multiples of 128 so the fused l|g "
        "slice and the output store stay lane-dense (see TODO for the fallback).")

    # Residual precision: keep p (and the output) in f32; halve r / weight traffic.
    p3 = p.reshape(B, N, Dp).astype(jnp.float32)          # p.squeeze(2)
    r3 = r.reshape(B, M, Dr).astype(jnp.bfloat16)         # r.squeeze(1)

    wh_bf = wh.astype(jnp.bfloat16)                               # (Dp, Dk)
    wlg_bf = jnp.concatenate([wl, wg], axis=1).astype(jnp.bfloat16)   # (Dr, Dk+Dp)
    bh_f = bh.astype(jnp.float32).reshape(1, Dk)
    blg_f = jnp.concatenate([bl, bg], axis=1).astype(jnp.float32).reshape(1, Dk + Dp)

    vmem_limit, multi_tc = _device_vmem_limit_and_megacore()
    budget = int(0.75 * vmem_limit)       # headroom: estimate under-counts scratch
    bt = block_batches or _pick_block_batches(B, N, M, Dp, Dr, Dk, budget, multi_tc)
    assert B % bt == 0, "block_batches must divide B"
    grid = (B // bt,)

    def _call(weight_pipeline_mode):
        wkw = {} if weight_pipeline_mode is None else dict(
            pipeline_mode=weight_pipeline_mode)
        return pl.pallas_call(
            skip_attention_kernel,
            out_shape=jax.ShapeDtypeStruct((B, N, Dp), p.dtype),
            grid=grid,
            in_specs=[
                pl.BlockSpec((bt, N, Dp), lambda b: (b, 0, 0)),         # p  (f32)
                pl.BlockSpec((bt, M, Dr), lambda b: (b, 0, 0)),         # r  (bf16)
                pl.BlockSpec((Dp, Dk), lambda b: (0, 0), **wkw),        # W_h
                pl.BlockSpec((1, Dk), lambda b: (0, 0), **wkw),         # b_h
                pl.BlockSpec((Dr, Dk + Dp), lambda b: (0, 0), **wkw),   # W_l | W_g
                pl.BlockSpec((1, Dk + Dp), lambda b: (0, 0), **wkw),    # b_l | b_g
            ],
            out_specs=pl.BlockSpec((bt, N, Dp), lambda b: (b, 0, 0)),
            compiler_params=pltpu.CompilerParams(
                dimension_semantics=("parallel",),
                vmem_limit_bytes=int(vmem_limit)),
        )(p3, r3, wh_bf, bh_f, wlg_bf, blg_f)

    try:
        # Grid-invariant weights: request single buffering to save their footprint.
        out = jax.block_until_ready(_call(pl.Buffered(1)))
    except Exception:
        # Fallback if this JAX/Mosaic version rejects pipeline_mode=Buffered(1).
        out = _call(None)
    return out


def reference(p, r, wh, bh, wl, bl, wg, bg):
    """Pure-JAX (f32) reference mirroring the PyTorch forward."""
    h = jnp.einsum('bnod,dk->bnok', p, wh) + bh            # (B, N, 1, Dk)
    l = jnp.einsum('bomd,dk->bomk', r, wl) + bl            # (B, 1, M, Dk)
    g = (jnp.einsum('bomd,dk->bomk', r, wg) + bg)[:, 0]    # (B, M, Dp)
    scores = jnp.einsum('bnok,bomk->bnm', h, l)            # (B, N, M)
    attn = jax.nn.softmax(scores, axis=-1)
    attended = jnp.einsum('bnm,bmd->bnd', attn, g)         # (B, N, Dp)
    return p[:, :, 0, :] + attended


if __name__ == "__main__":
    # Small, lane-aligned demo shapes (Dk = Dp = 128 so the fused-projection slice
    # and the output stores are lane-dense).
    B, N, M, Dp, Dr, Dk = 4, 16, 32, 128, 128, 128

    key = jax.random.PRNGKey(0)
    k_p, k_r, k_wh, k_bh, k_wl, k_bl, k_wg, k_bg = jax.random.split(key, 8)

    p = jax.random.normal(k_p, (B, N, 1, Dp), dtype=jnp.float32)
    r = jax.random.normal(k_r, (B, 1, M, Dr), dtype=jnp.float32)

    s = 0.03
    wh = s * jax.random.normal(k_wh, (Dp, Dk), dtype=jnp.float32)
    bh = s * jax.random.normal(k_bh, (1, Dk), dtype=jnp.float32)
    wl = s * jax.random.normal(k_wl, (Dr, Dk), dtype=jnp.float32)
    bl = s * jax.random.normal(k_bl, (1, Dk), dtype=jnp.float32)
    wg = s * jax.random.normal(k_wg, (Dr, Dp), dtype=jnp.float32)
    bg = s * jax.random.normal(k_bg, (1, Dp), dtype=jnp.float32)

    out = skip_attention(p, r, wh, bh, wl, bl, wg, bg)
    out = jax.block_until_ready(out)

    ref = reference(p, r, wh, bh, wl, bl, wg, bg)
    assert out.shape == (B, N, Dp)
    # Tolerance loosened vs a pure-f32 reference: all four matmuls run with bf16
    # MXU operands (f32 accumulation) and the softmax denominator uses the EUP
    # approx reciprocal — standard flash-attention-level accuracy trade.
    assert jnp.allclose(out, ref, atol=5e-2, rtol=5e-2), "mismatch vs reference"

    print("KERNEL_OK")
</pallas_src>

<mosaic_0001>
module attributes {stable_mosaic.version = 11 : i64} {
  func.func @skip_attention_kernel(%arg0: i32, %arg1: memref<4x16x128xf32, #tpu.memory_space<vmem>>, %arg2: memref<4x32x128xbf16, #tpu.memory_space<vmem>>, %arg3: memref<128x128xbf16, #tpu.memory_space<vmem>>, %arg4: memref<1x128xf32, #tpu.memory_space<vmem>>, %arg5: memref<128x256xbf16, #tpu.memory_space<vmem>>, %arg6: memref<1x256xf32, #tpu.memory_space<vmem>>, %arg7: memref<4x16x128xf32, #tpu.memory_space<vmem>>) attributes {dimension_semantics = [#tpu.dimension_semantics<parallel>], iteration_bounds = array<i64: 1>, scalar_prefetch = 0 : i64, scratch_operands = 0 : i64, tpu.core_type = #tpu.core_type<tc>, window_params = [{transform_indices = @transform_0, window_bounds = array<i64: 4, 16, 128>}, {transform_indices = @transform_1, window_bounds = array<i64: 4, 32, 128>}, {pipeline_mode = #tpu.pipeline_mode<synchronous>, transform_indices = @transform_2, window_bounds = array<i64: 128, 128>}, {pipeline_mode = #tpu.pipeline_mode<synchronous>, transform_indices = @transform_3, window_bounds = array<i64: 1, 128>}, {pipeline_mode = #tpu.pipeline_mode<synchronous>, transform_indices = @transform_4, window_bounds = array<i64: 128, 256>}, {pipeline_mode = #tpu.pipeline_mode<synchronous>, transform_indices = @transform_5, window_bounds = array<i64: 1, 256>}, {transform_indices = @transform_6, window_bounds = array<i64: 4, 16, 128>}]} {
    %c0 = arith.constant 0 : index
    %c0_0 = arith.constant 0 : index
    %c0_1 = arith.constant 0 : index
    %0 = vector.load %arg1[%c0, %c0_0, %c0_1] : memref<4x16x128xf32, #tpu.memory_space<vmem>>, vector<4x16x128xf32>
    %1 = arith.truncf %0 : vector<4x16x128xf32> to vector<4x16x128xbf16>
    %2 = vector.shape_cast %1 : vector<4x16x128xbf16> to vector<64x128xbf16>
    %c0_2 = arith.constant 0 : index
    %c0_3 = arith.constant 0 : index
    %3 = vector.load %arg3[%c0_2, %c0_3] : memref<128x128xbf16, #tpu.memory_space<vmem>>, vector<128x128xbf16>
    %cst = arith.constant dense<0.000000e+00> : vector<64x128xf32>
    %4 = tpu.matmul %2, %3, %cst {dimension_numbers = #tpu.dot_dimension_numbers<[1], [0], [0], [1], [0, 0, 1, 1], [], []>} : vector<64x128xbf16>, vector<128x128xbf16>, vector<64x128xf32> -> vector<64x128xf32>
    %c0_4 = arith.constant 0 : index
    %c0_5 = arith.constant 0 : index
    %5 = vector.load %arg4[%c0_4, %c0_5] : memref<1x128xf32, #tpu.memory_space<vmem>>, vector<1x128xf32>
    %6 = vector.broadcast %5 : vector<1x128xf32> to vector<64x128xf32>
    %7 = arith.addf %4, %6 : vector<64x128xf32>
    %8 = vector.shape_cast %7 : vector<64x128xf32> to vector<4x16x128xf32>
    %c0_6 = arith.constant 0 : index
    %c0_7 = arith.constant 0 : index
    %c0_8 = arith.constant 0 : index
    %9 = vector.load %arg2[%c0_6, %c0_7, %c0_8] : memref<4x32x128xbf16, #tpu.memory_space<vmem>>, vector<4x32x128xbf16>
    %10 = vector.shape_cast %9 : vector<4x32x128xbf16> to vector<128x128xbf16>
    %c0_9 = arith.constant 0 : index
    %c0_10 = arith.constant 0 : index
    %11 = vector.load %arg5[%c0_9, %c0_10] : memref<128x256xbf16, #tpu.memory_space<vmem>>, vector<128x256xbf16>
    %cst_11 = arith.constant dense<0.000000e+00> : vector<128x256xf32>
    %12 = tpu.matmul %10, %11, %cst_11 {dimension_numbers = #tpu.dot_dimension_numbers<[1], [0], [0], [1], [0, 0, 1, 1], [], []>} : vector<128x128xbf16>, vector<128x256xbf16>, vector<128x256xf32> -> vector<128x256xf32>
    %c0_12 = arith.constant 0 : index
    %c0_13 = arith.constant 0 : index
    %13 = vector.load %arg6[%c0_12, %c0_13] : memref<1x256xf32, #tpu.memory_space<vmem>>, vector<1x256xf32>
    %14 = vector.broadcast %13 : vector<1x256xf32> to vector<128x256xf32>
    %15 = arith.addf %12, %14 : vector<128x256xf32>
    %16 = vector.shape_cast %15 : vector<128x256xf32> to vector<4x32x256xf32>
    %17 = vector.extract_strided_slice %16 {offsets = [0, 0, 0], sizes = [4, 32, 128], strides = [1, 1, 1]} : vector<4x32x256xf32> to vector<4x32x128xf32>
    %18 = arith.truncf %17 : vector<4x32x128xf32> to vector<4x32x128xbf16>
    %19 = vector.extract_strided_slice %16 {offsets = [0, 0, 128], sizes = [4, 32, 128], strides = [1, 1, 1]} : vector<4x32x256xf32> to vector<4x32x128xf32>
    %20 = arith.truncf %19 : vector<4x32x128xf32> to vector<4x32x128xbf16>
    %21 = arith.truncf %8 : vector<4x16x128xf32> to vector<4x16x128xbf16>
    %cst_14 = arith.constant dense<0.000000e+00> : vector<4x16x32xf32>
    %22 = tpu.matmul %21, %18, %cst_14 {dimension_numbers = #tpu.dot_dimension_numbers<[2], [2], [1], [1], [0, 0, 0, 1, 1, 1], [0], [0]>} : vector<4x16x128xbf16>, vector<4x32x128xbf16>, vector<4x16x32xf32> -> vector<4x16x32xf32>
    %cst_15 = arith.constant dense<0xFF800000> : vector<4x16xf32>
    %23 = vector.multi_reduction <maximumf>, %22, %cst_15 [2] : vector<4x16x32xf32> to vector<4x16xf32>
    %24 = vector.shape_cast %23 : vector<4x16xf32> to vector<4x16x1xf32>
    %25 = vector.broadcast %24 : vector<4x16x1xf32> to vector<4x16x32xf32>
    %26 = arith.subf %22, %25 : vector<4x16x32xf32>
    %27 = math.exp %26 : vector<4x16x32xf32>
    %cst_16 = arith.constant dense<0.000000e+00> : vector<4x16xf32>
    %28 = vector.multi_reduction <add>, %27, %cst_16 [2] : vector<4x16x32xf32> to vector<4x16xf32>
    %29 = vector.shape_cast %28 : vector<4x16xf32> to vector<4x16x1xf32>
    %30 = arith.truncf %27 : vector<4x16x32xf32> to vector<4x16x32xbf16>
    %cst_17 = arith.constant dense<0.000000e+00> : vector<4x16x128xf32>
    %31 = tpu.matmul %30, %20, %cst_17 {dimension_numbers = #tpu.dot_dimension_numbers<[2], [1], [1], [2], [0, 0, 0, 1, 1, 2], [0], [0]>} : vector<4x16x32xbf16>, vector<4x32x128xbf16>, vector<4x16x128xf32> -> vector<4x16x128xf32>
    %32 = tpu.reciprocal %29 {approx = true} : vector<4x16x1xf32> -> vector<4x16x1xf32>
    %33 = vector.broadcast %32 : vector<4x16x1xf32> to vector<4x16x128xf32>
    %34 = arith.mulf %31, %33 : vector<4x16x128xf32>
    %c0_18 = arith.constant 0 : index
    %c0_19 = arith.constant 0 : index
    %c0_20 = arith.constant 0 : index
    %35 = vector.load %arg1[%c0_18, %c0_19, %c0_20] : memref<4x16x128xf32, #tpu.memory_space<vmem>>, vector<4x16x128xf32>
    %36 = arith.addf %35, %34 : vector<4x16x128xf32>
    %c0_21 = arith.constant 0 : index
    %c0_22 = arith.constant 0 : index
    %c0_23 = arith.constant 0 : index
    %37 = vector.load %arg7[%c0_21, %c0_22, %c0_23] : memref<4x16x128xf32, #tpu.memory_space<vmem>>, vector<4x16x128xf32>
    tpu.vector_store %arg7[%c0_21, %c0_22, %c0_23], %36 {strides = array<i32>} : memref<4x16x128xf32, #tpu.memory_space<vmem>>, vector<4x16x128xf32>,
    return
  }
  func.func @transform_0(%arg0: i32) -> (i32, i32, i32) {
    %c0_i32 = arith.constant 0 : i32
    %c0_i32_0 = arith.constant 0 : i32
    %c0_i32_1 = arith.constant 0 : i32
    return %arg0, %c0_i32, %c0_i32_0 : i32, i32, i32
  }
  func.func @transform_1(%arg0: i32) -> (i32, i32, i32) {
    %c0_i32 = arith.constant 0 : i32
    %c0_i32_0 = arith.constant 0 : i32
    %c0_i32_1 = arith.constant 0 : i32
    return %arg0, %c0_i32, %c0_i32_0 : i32, i32, i32
  }
  func.func @transform_2(%arg0: i32) -> (i32, i32) {
    %c0_i32 = arith.constant 0 : i32
    %c0_i32_0 = arith.constant 0 : i32
    %c0_i32_1 = arith.constant 0 : i32
    return %c0_i32, %c0_i32_0 : i32, i32
  }
  func.func @transform_3(%arg0: i32) -> (i32, i32) {
    %c0_i32 = arith.constant 0 : i32
    %c0_i32_0 = arith.constant 0 : i32
    %c0_i32_1 = arith.constant 0 : i32
    return %c0_i32, %c0_i32_0 : i32, i32
  }
  func.func @transform_4(%arg0: i32) -> (i32, i32) {
    %c0_i32 = arith.constant 0 : i32
    %c0_i32_0 = arith.constant 0 : i32
    %c0_i32_1 = arith.constant 0 : i32
    return %c0_i32, %c0_i32_0 : i32, i32
  }
  func.func @transform_5(%arg0: i32) -> (i32, i32) {
    %c0_i32 = arith.constant 0 : i32
    %c0_i32_0 = arith.constant 0 : i32
    %c0_i32_1 = arith.constant 0 : i32
    return %c0_i32, %c0_i32_0 : i32, i32
  }
  func.func @transform_6(%arg0: i32) -> (i32, i32, i32) {
    %c0_i32 = arith.constant 0 : i32
    %c0_i32_0 = arith.constant 0 : i32
    %c0_i32_1 = arith.constant 0 : i32
    return %arg0, %c0_i32, %c0_i32_0 : i32, i32, i32
  }
}

module attributes {stable_mosaic.version = 11 : i64} {
  func.func @skip_attention_kernel(%arg0: i32, %arg1: memref<4x16x128xf32, #tpu.memory_space<vmem>>, %arg2: memref<4x32x128xbf16, #tpu.memory_space<vmem>>, %arg3: memref<128x128xbf16, #tpu.memory_space<vmem>>, %arg4: memref<1x128xf32, #tpu.memory_space<vmem>>, %arg5: memref<128x256xbf16, #tpu.memory_space<vmem>>, %arg6: memref<1x256xf32, #tpu.memory_space<vmem>>, %arg7: memref<4x16x128xf32, #tpu.memory_space<vmem>>) attributes {dimension_semantics = [#tpu.dimension_semantics<parallel>], iteration_bounds = array<i64: 1>, scalar_prefetch = 0 : i64, scratch_operands = 0 : i64, tpu.core_type = #tpu.core_type<tc>, window_params = [{transform_indices = @transform_0, window_bounds = array<i64: 4, 16, 128>}, {transform_indices = @transform_1, window_bounds = array<i64: 4, 32, 128>}, {pipeline_mode = #tpu.pipeline_mode<synchronous>, transform_indices = @transform_2, window_bounds = array<i64: 128, 128>}, {pipeline_mode = #tpu.pipeline_mode<synchronous>, transform_indices = @transform_3, window_bounds = array<i64: 1, 128>}, {pipeline_mode = #tpu.pipeline_mode<synchronous>, transform_indices = @transform_4, window_bounds = array<i64: 128, 256>}, {pipeline_mode = #tpu.pipeline_mode<synchronous>, transform_indices = @transform_5, window_bounds = array<i64: 1, 256>}, {transform_indices = @transform_6, window_bounds = array<i64: 4, 16, 128>}]} {
    %c0 = arith.constant 0 : index
    %c0_0 = arith.constant 0 : index
    %c0_1 = arith.constant 0 : index
    %0 = vector.load %arg1[%c0, %c0_0, %c0_1] : memref<4x16x128xf32, #tpu.memory_space<vmem>>, vector<4x16x128xf32>
    %1 = arith.truncf %0 : vector<4x16x128xf32> to vector<4x16x128xbf16>
    %2 = vector.shape_cast %1 : vector<4x16x128xbf16> to vector<64x128xbf16>
    %c0_2 = arith.constant 0 : index
    %c0_3 = arith.constant 0 : index
    %3 = vector.load %arg3[%c0_2, %c0_3] : memref<128x128xbf16, #tpu.memory_space<vmem>>, vector<128x128xbf16>
    %cst = arith.constant dense<0.000000e+00> : vector<64x128xf32>
    %4 = tpu.matmul %2, %3, %cst {dimension_numbers = #tpu.dot_dimension_numbers<[1], [0], [0], [1], [0, 0, 1, 1], [], []>} : vector<64x128xbf16>, vector<128x128xbf16>, vector<64x128xf32> -> vector<64x128xf32>
    %c0_4 = arith.constant 0 : index
    %c0_5 = arith.constant 0 : index
    %5 = vector.load %arg4[%c0_4, %c0_5] : memref<1x128xf32, #tpu.memory_space<vmem>>, vector<1x128xf32>
    %6 = vector.broadcast %5 : vector<1x128xf32> to vector<64x128xf32>
    %7 = arith.addf %4, %6 : vector<64x128xf32>
    %8 = vector.shape_cast %7 : vector<64x128xf32> to vector<4x16x128xf32>
    %c0_6 = arith.constant 0 : index
    %c0_7 = arith.constant 0 : index
    %c0_8 = arith.constant 0 : index
    %9 = vector.load %arg2[%c0_6, %c0_7, %c0_8] : memref<4x32x128xbf16, #tpu.memory_space<vmem>>, vector<4x32x128xbf16>
    %10 = vector.shape_cast %9 : vector<4x32x128xbf16> to vector<128x128xbf16>
    %c0_9 = arith.constant 0 : index
    %c0_10 = arith.constant 0 : index
    %11 = vector.load %arg5[%c0_9, %c0_10] : memref<128x256xbf16, #tpu.memory_space<vmem>>, vector<128x256xbf16>
    %cst_11 = arith.constant dense<0.000000e+00> : vector<128x256xf32>
    %12 = tpu.matmul %10, %11, %cst_11 {dimension_numbers = #tpu.dot_dimension_numbers<[1], [0], [0], [1], [0, 0, 1, 1], [], []>} : vector<128x128xbf16>, vector<128x256xbf16>, vector<128x256xf32> -> vector<128x256xf32>
    %c0_12 = arith.constant 0 : index
    %c0_13 = arith.constant 0 : index
    %13 = vector.load %arg6[%c0_12, %c0_13] : memref<1x256xf32, #tpu.memory_space<vmem>>, vector<1x256xf32>
    %14 = vector.broadcast %13 : vector<1x256xf32> to vector<128x256xf32>
    %15 = arith.addf %12, %14 : vector<128x256xf32>
    %16 = vector.shape_cast %15 : vector<128x256xf32> to vector<4x32x256xf32>
    %17 = vector.extract_strided_slice %16 {offsets = [0, 0, 0], sizes = [4, 32, 128], strides = [1, 1, 1]} : vector<4x32x256xf32> to vector<4x32x128xf32>
    %18 = arith.truncf %17 : vector<4x32x128xf32> to vector<4x32x128xbf16>
    %19 = vector.extract_strided_slice %16 {offsets = [0, 0, 128], sizes = [4, 32, 128], strides = [1, 1, 1]} : vector<4x32x256xf32> to vector<4x32x128xf32>
    %20 = arith.truncf %19 : vector<4x32x128xf32> to vector<4x32x128xbf16>
    %21 = arith.truncf %8 : vector<4x16x128xf32> to vector<4x16x128xbf16>
    %cst_14 = arith.constant dense<0.000000e+00> : vector<4x16x32xf32>
    %22 = tpu.matmul %21, %18, %cst_14 {dimension_numbers = #tpu.dot_dimension_numbers<[2], [2], [1], [1], [0, 0, 0, 1, 1, 1], [0], [0]>} : vector<4x16x128xbf16>, vector<4x32x128xbf16>, vector<4x16x32xf32> -> vector<4x16x32xf32>
    %cst_15 = arith.constant dense<0xFF800000> : vector<4x16xf32>
    %23 = vector.multi_reduction <maximumf>, %22, %cst_15 [2] : vector<4x16x32xf32> to vector<4x16xf32>
    %24 = vector.shape_cast %23 : vector<4x16xf32> to vector<4x16x1xf32>
    %25 = vector.broadcast %24 : vector<4x16x1xf32> to vector<4x16x32xf32>
    %26 = arith.subf %22, %25 : vector<4x16x32xf32>
    %27 = math.exp %26 : vector<4x16x32xf32>
    %cst_16 = arith.constant dense<0.000000e+00> : vector<4x16xf32>
    %28 = vector.multi_reduction <add>, %27, %cst_16 [2] : vector<4x16x32xf32> to vector<4x16xf32>
    %29 = vector.shape_cast %28 : vector<4x16xf32> to vector<4x16x1xf32>
    %30 = arith.truncf %27 : vector<4x16x32xf32> to vector<4x16x32xbf16>
    %cst_17 = arith.constant dense<0.000000e+00> : vector<4x16x128xf32>
    %31 = tpu.matmul %30, %20, %cst_17 {dimension_numbers = #tpu.dot_dimension_numbers<[2], [1], [1], [2], [0, 0, 0, 1, 1, 2], [0], [0]>} : vector<4x16x32xbf16>, vector<4x32x128xbf16>, vector<4x16x128xf32> -> vector<4x16x128xf32>
    %32 = tpu.reciprocal %29 {approx = true} : vector<4x16x1xf32> -> vector<4x16x1xf32>
    %33 = vector.broadcast %32 : vector<4x16x1xf32> to vector<4x16x128xf32>
    %34 = arith.mulf %31, %33 : vector<4x16x128xf32>
    %c0_18 = arith.constant 0 : index
    %c0_19 = arith.constant 0 : index
    %c0_20 = arith.constant 0 : index
    %35 = vector.load %arg1[%c0_18, %c0_19, %c0_20] : memref<4x16x128xf32, #tpu.memory_space<vmem>>, vector<4x16x128xf32>
    %36 = arith.addf %35, %34 : vector<4x16x128xf32>
    %c0_21 = arith.constant 0 : index
    %c0_22 = arith.constant 0 : index
    %c0_23 = arith.constant 0 : index
    %37 = vector.load %arg7[%c0_21, %c0_22, %c0_23] : memref<4x16x128xf32, #tpu.memory_space<vmem>>, vector<4x16x128xf32>
    tpu.vector_store %arg7[%c0_21, %c0_22, %c0_23], %36 {strides = array<i32>} : memref<4x16x128xf32, #tpu.memory_space<vmem>>, vector<4x16x128xf32>,
    return
  }
  func.func @transform_0(%arg0: i32) -> (i32, i32, i32) {
    %c0_i32 = arith.constant 0 : i32
    %c0_i32_0 = arith.constant 0 : i32
    %c0_i32_1 = arith.constant 0 : i32
    return %arg0, %c0_i32, %c0_i32_0 : i32, i32, i32
  }
  func.func @transform_1(%arg0: i32) -> (i32, i32, i32) {
    %c0_i32 = arith.constant 0 : i32
    %c0_i32_0 = arith.constant 0 : i32
    %c0_i32_1 = arith.constant 0 : i32
    return %arg0, %c0_i32, %c0_i32_0 : i32, i32, i32
  }
  func.func @transform_2(%arg0: i32) -> (i32, i32) {
    %c0_i32 = arith.constant 0 : i32
    %c0_i32_0 = arith.constant 0 : i32
    %c0_i32_1 = arith.constant 0 : i32
    return %c0_i32, %c0_i32_0 : i32, i32
  }
  func.func @transform_3(%arg0: i32) -> (i32, i32) {
    %c0_i32 = arith.constant 0 : i32
    %c0_i32_0 = arith.constant 0 : i32
    %c0_i32_1 = arith.constant 0 : i32
    return %c0_i32, %c0_i32_0 : i32, i32
  }
  func.func @transform_4(%arg0: i32) -> (i32, i32) {
    %c0_i32 = arith.constant 0 : i32
    %c0_i32_0 = arith.constant 0 : i32
    %c0_i32_1 = arith.constant 0 : i32
    return %c0_i32, %c0_i32_0 : i32, i32
  }
  func.func @transform_5(%arg0: i32) -> (i32, i32) {
    %c0_i32 = arith.constant 0 : i32
    %c0_i32_0 = arith.constant 0 : i32
    %c0_i32_1 = arith.constant 0 : i32
    return %c0_i32, %c0_i32_0 : i32, i32
  }
  func.func @transform_6(%arg0: i32) -> (i32, i32, i32) {
    %c0_i32 = arith.constant 0 : i32
    %c0_i32_0 = arith.constant 0 : i32
    %c0_i32_1 = arith.constant 0 : i32
    return %arg0, %c0_i32, %c0_i32_0 : i32, i32, i32
  }
}

</mosaic_0001>

<bundles_post_ra>
// kernel: tpu_custom_call.1
= control target key start
LH: loop header
LB: loop body
LE: loop exit
PB: predicated region body
PF: predicated region fallthrough
CT: control target
= control target key end

     0   :  { %11 = vsyncpa [#allocation3], 0  ;;  %s1623_s0 = inlined_call_operand.hbm [shape: f32[4,16,128], index: 0, kind: input, shape index: {}]   ;;  %s1624_s1 = inlined_call_operand.hbm [shape: bf16[4,32,128], index: 1, kind: input, shape index: {}]   ;;  %s1625_s2 = inlined_call_operand.hbm [shape: bf16[128,128], index: 2, kind: input, shape index: {}]   ;;  %s1626_s3 = inlined_call_operand.vmem [shape: f32[1,128], index: 3, kind: input, shape index: {}]   ;;  %s1627_s4 = inlined_call_operand.hbm [shape: bf16[128,256], index: 4, kind: input, shape index: {}]   ;;  %s1628_s5 = inlined_call_operand.vmem [shape: f32[1,256], index: 5, kind: input, shape index: {}]   ;;  %s1629_s6 = inlined_call_operand.hbm [shape: f32[4,16,128], index: 6, kind: output, shape index: {}]  }
   0x1   :  { %12 = vsyncpa [#allocation6], 0 }
   0x2   :  { %13 = vsyncpa [#allocation9], 0 }
   0x3   :  { %14 = vsyncpa [#allocation4], 0  ;;  %s1354_s21 = smov [#allocation5]  }
   0x4   :  { %s32_s22 = sshll.u32 %s1354_s21, 4  ;;  %s33_s22 = int_to_ptr.vmem [resolvable:$true] %s32_s22 }
   0x5   :  { %s1254_s23 = scalar_lea.vmem %s33_s22, 1024  ;;  %p1259_p1 = scmp.lt.s32.totalorder %s33_s22, %s33_s22 }
   0x6   :  { %p1255_p0 = scmp.ne.s32.totalorder %s33_s22, %s1254_s23  ;;  %p1260_p2 = scmp.lt.s32.totalorder %s1254_s23, %s1254_s23 }
   0x8   :  { %p1261_p3 = por %p1260_p2, %p1259_p1 }
   0xa   :  { %p1262_p4 = pnand %p1261_p3, %p1255_p0 }
   0xc   :  { %1265 = shalt.err (!%p1262_p4)
}
   0xd   :  { %s1355_s24 = smov 64   ;;  %s1356_s25 = smov 4  }
   0xe   :  { %38 = dma.hbm_to_vmem [thread:$0]  %s1624_s1, 1024, %s33_s22, [#allocation6], %s1355_s24, %s1355_s24, %s1356_s25  }
   0xf   :  { %s1357_s28 = smov [#allocation2]  }
  0x10   :  { %s20_s29 = sshll.u32 %s1357_s28, 4  ;;  %s21_s29 = int_to_ptr.vmem [resolvable:$true] %s20_s29 }
  0x11   :  { %s1274_s30 = scalar_lea.vmem %s21_s29, 1024  ;;  %p1279_p6 = scmp.lt.s32.totalorder %s21_s29, %s21_s29 }
  0x12   :  { %p1275_p5 = scmp.ne.s32.totalorder %s21_s29, %s1274_s30  ;;  %p1280_p7 = scmp.lt.s32.totalorder %s1274_s30, %s1274_s30 }
  0x14   :  { %p1281_p8 = por %p1280_p7, %p1279_p6 }
  0x16   :  { %p1282_p9 = pnand %p1281_p8, %p1275_p5 }
  0x18   :  { %1285 = shalt.err (!%p1282_p9)
}
  0x19   :  { %s1358_s7 = smov 128   ;;  %s1359_s8 = smov 8  }
  0x1a   :  { %26 = dma.hbm_to_vmem [thread:$0]  %s1623_s0, 1024, %s21_s29, [#allocation3], %s1358_s7, %s1358_s7, %s1359_s8  }
  0x1b   :  { %s1360_s1 = smov [#allocation7]   ;;  %s1361_s12 = smov [#allocation8]  }
  0x1c   :  { %s44_s11 = sshll.u32 %s1360_s1, 4  ;;  %s58_s13 = sshll.u32 %s1361_s12, 4  ;;  %s45_s11 = int_to_ptr.vmem [resolvable:$true] %s44_s11  ;;  %s59_s13 = int_to_ptr.vmem [resolvable:$true] %s58_s13 }
  0x1d   :  { %s1294_s14 = scalar_lea.vmem %s45_s11, 1024  ;;  %p1299_p11 = scmp.lt.s32.totalorder %s45_s11, %s45_s11 }
  0x1e   :  { %p1295_p10 = scmp.ne.s32.totalorder %s45_s11, %s1294_s14  ;;  %p1300_p12 = scmp.lt.s32.totalorder %s1294_s14, %s1294_s14 }
  0x20   :  { %p1301_p13 = por %p1300_p12, %p1299_p11 }
  0x22   :  { %p1302_p0 = pnand %p1301_p13, %p1295_p10 }
  0x24   :  { %1305 = shalt.err (!%p1302_p0)
}
  0x25   :  { %50 = dma.hbm_to_vmem [thread:$0]  %s1625_s2, 1024, %s45_s11, [#allocation6], %s1355_s24, %s1355_s24, %s1356_s25  }
  0x26   :  { %s1314_s0 = scalar_lea.vmem %s59_s13, 2048  ;;  %p1319_p2 = scmp.lt.s32.totalorder %s59_s13, %s59_s13 }
  0x27   :  { %p1315_p1 = scmp.ne.s32.totalorder %s59_s13, %s1314_s0  ;;  %p1320_p3 = scmp.lt.s32.totalorder %s1314_s0, %s1314_s0 }
  0x29   :  { %p1321_p4 = por %p1320_p3, %p1319_p2 }
  0x2b   :  { %p1322_p5 = pnand %p1321_p4, %p1315_p1 }
  0x2d   :  { %1325 = shalt.err (!%p1322_p5)
}
  0x2e   :  { %64 = dma.hbm_to_vmem [thread:$0]  %s1627_s4, 2048, %s59_s13, [#allocation9], %s1358_s7, %s1358_s7, %s1359_s8  }
  0x2f   :  { %1346 = dma.done.wait [#allocation3], 1024  }
  0x30   :  { %1347 = vsyncadd [#allocation3], 4294966272 }
  0x31   :  { %1348 = dma.done.wait [#allocation6], 2048  }
  0x32   :  { %1349 = vsyncadd [#allocation6], 4294965248 }
  0x33   :  { %1350 = dma.done.wait [#allocation9], 2048  }
  0x34   :  { %1351 = vsyncadd [#allocation9], 4294965248  ;;  %v1362_v0 = vmov 0   ;;  %v1174_v1 = vld [vmem:[#allocation8 + $0x74] ss:$8 sps:$4 sm:$0xff]   ;;  %v1194_v10 = vld [vmem:[#allocation7 + $0x28] sm:$0xff]   ;;  %v262_v46 = vlaneseq }
  0x35   :  { %432 = vmatprep.mubr.bf16.mxu1 %v1362_v0  ;;  %v1176_v2 = vld [vmem:[#allocation8 + $0x70] ss:$8 sps:$4 sm:$0xff]   ;;  %400 = vmatprep.subr.bf16.mxu1 %v1174_v1  ;;  %v1177_v3 = vld [vmem:[#allocation8 + $0x64] ss:$8 sps:$4 sm:$0xff]   ;;  %v1179_v4 = vld [vmem:[#allocation8 + $0x60] ss:$8 sps:$4 sm:$0xff]  }
  0x36   :  { %401 = vmatpush1.bf16.msra.mxu1 %v1176_v2  ;;  %v1180_v5 = vld [vmem:[#allocation8 + $0x54] ss:$8 sps:$4 sm:$0xff]   ;;  %v1182_v7 = vld [vmem:[#allocation8 + $0x50] ss:$8 sps:$4 sm:$0xff]   ;;  %v1183_v8 = vld [vmem:[#allocation8 + $0x44] ss:$8 sps:$4 sm:$0xff]  }
  0x37   :  { %402 = vmatprep.subr.bf16.mxu1 %v1177_v3  ;;  %v1186_v6 = vld [vmem:[#allocation7 + $0x38] sm:$0xff]   ;;  %v1190_v9 = vld [vmem:[#allocation7 + $0x30] sm:$0xff]   ;;  %v1185_v11 = vld [vmem:[#allocation8 + $0x40] ss:$8 sps:$4 sm:$0xff]   ;;  %v1363_v45 = vmov 0.0   ;;  %vm1364_vm0 = vmmov 0  }
  0x38   :  { %1074 = vmatprep.subr.bf16.mxu0 %v1186_v6  ;;  %v1187_v12 = vld [vmem:[#allocation8 + $0x34] ss:$8 sps:$4 sm:$0xff]   ;;  %v1198_v13 = vld [vmem:[#allocation7 + $0x20] sm:$0xff]   ;;  %v1189_v14 = vld [vmem:[#allocation8 + $0x30] ss:$8 sps:$4 sm:$0xff]   ;;  %v263_v49 = vshrl.u32 %v262_v46, 7 }
  0x39   :  { %1075 = vmatpush3.bf16.msra.mxu0 %v1186_v6  ;;  %v1191_v15 = vld [vmem:[#allocation8 + $0x24] ss:$8 sps:$4 sm:$0xff]   ;;  %v1202_v16 = vld [vmem:[#allocation7 + $0x18] sm:$0xff]   ;;  %v1193_v17 = vld [vmem:[#allocation8 + $0x20] ss:$8 sps:$4 sm:$0xff]   ;;  %vm697_vm1 = vcmask 261120  }
  0x3a   :  { %403 = vmatpush1.bf16.msra.mxu1 %v1179_v4  ;;  %1076 = vmatprep.subr.bf16.mxu0 %v1190_v9  ;;  %v1195_v18 = vld [vmem:[#allocation8 + $0x14] ss:$8 sps:$4 sm:$0xff]   ;;  %v1426_v19 = vld [vmem:[#allocation2] sm:$0xff]  ;;  %v1428_v20 = vld [vmem:[#allocation2 + $0x8] sm:$0xff]  ;;  %v264_v52 = vsub.s32 0, %v263_v49  ;;  %v268_v55 = vsub.s32 1, %v263_v49 }
  0x3b   :  { %404 = vmatprep.subr.bf16.mxu1 %v1180_v5  ;;  %v1204_v21 = vld [vmem:[#allocation7 + $0x10] sm:$0xff]   ;;  %v88_v22 = vpack.c.bf16 %v1428_v20, %v1426_v19  ;;  %v1199_v24 = vld [vmem:[#allocation8 + $0x4] ss:$8 sps:$4 sm:$0xff]   ;;  %v1201_v26 = vld [vmem:[#allocation8] ss:$8 sps:$4 sm:$0xff]  }
  0x3c   :  { %v1197_v23 = vld [vmem:[#allocation8 + $0x10] ss:$8 sps:$4 sm:$0xff]   ;;  %v1205_v25 = vld [vmem:[#allocation7 + $0x8] sm:$0xff]   ;;  %v1203_v27 = vld [vmem:[#allocation5] sm:$0xff]  }
  0x3d   :  { %1077 = vmatpush3.bf16.msra.mxu0 %v1190_v9  ;;  %1090 = vmatprep.mubr.bf16.mxu0 %v88_v22  ;;  %v1207_v28 = vld [vmem:[#allocation7] sm:$0xff]   ;;  %v1432_v29 = vld [vmem:[#allocation2 + $0x10] sm:$0xff]  ;;  %v1434_v30 = vld [vmem:[#allocation2 + $0x18] sm:$0xff] }
  0x3e   :  { %405 = vmatpush1.bf16.msra.mxu1 %v1182_v7  ;;  %1078 = vmatprep.subr.bf16.mxu0 %v1194_v10  ;;  %v1436_v31 = vld [vmem:[#allocation2 + $0x20] sm:$0xff]  ;;  %v1438_v32 = vld [vmem:[#allocation2 + $0x28] sm:$0xff]  ;;  %v89_v33 = vpack.c.bf16 %v1434_v30, %v1432_v29  ;;  %v1445_v36 = vld [vmem:[#allocation2 + $0x30] sm:$0xff] }
  0x3f   :  { %406 = vmatprep.subr.bf16.mxu1 %v1183_v8  ;;  %v90_v34 = vpack.c.bf16 %v1438_v32, %v1436_v31  ;;  %v1206_v35 = vld [vmem:[#allocation5 + $0x8] sm:$0xff]   ;;  %v1447_v37 = vld [vmem:[#allocation2 + $0x38] sm:$0xff]  ;;  %v1208_v39 = vld [vmem:[#allocation5 + $0x10] sm:$0xff]  }
  0x40   :  { %v91_v38 = vpack.c.bf16 %v1447_v37, %v1445_v36  ;;  %v1209_v40 = vld [vmem:[#allocation5 + $0x18] sm:$0xff]   ;;  %v1210_v41 = vld [vmem:[#allocation5 + $0x20] sm:$0xff]   ;;  %v1211_v42 = vld [vmem:[#allocation5 + $0x28] sm:$0xff]  }
  0x41   :  { %1079 = vmatpush3.bf16.msra.mxu0 %v1194_v10  ;;  %v1212_v43 = vld [vmem:[#allocation5 + $0x30] sm:$0xff]   ;;  %v1213_v44 = vld [vmem:[#allocation5 + $0x38] sm:$0xff]   ;;  %v260_v53 = vld [vmem:[%s1628_s5] sm:$0x3] }
  0x42   :  { %407 = vmatpush1.bf16.msra.mxu1 %v1185_v11  ;;  %1080 = vmatprep.subr.bf16.mxu0 %v1198_v13  ;;  %v1466_v57 = vrot.slane %v260_v53, %v264_v52  ;;  %v1468_v60 = vrot.slane %v260_v53, %v268_v55 }
  0x43   :  { %408 = vmatprep.subr.bf16.mxu1 %v1187_v12 }
  0x45   :  { %1081 = vmatpush3.bf16.msra.mxu0 %v1198_v13 }
  0x46   :  { %409 = vmatpush1.bf16.msra.mxu1 %v1189_v14  ;;  %1082 = vmatprep.subr.bf16.mxu0 %v1202_v16 }
  0x47   :  { %410 = vmatprep.subr.bf16.mxu1 %v1191_v15 }
  0x49   :  { %1083 = vmatpush3.bf16.msra.mxu0 %v1202_v16  ;;  %v1487_v16 = vld [vmem:[%s1626_s3] ss:$0 sm:$0xff]  ;;  %s1365_s3 = smov [#allocation10]  }
  0x4a   :  { %411 = vmatpush1.bf16.msra.mxu1 %v1193_v17  ;;  %1084 = vmatprep.subr.bf16.mxu0 %v1204_v21  ;;  %s987_s20 = sshll.u32 %s1365_s3, 4  ;;  %s988_s20 = int_to_ptr.vmem [resolvable:$true] %s987_s20 }
  0x4b   :  { %412 = vmatprep.subr.bf16.mxu1 %v1195_v18  ;;  %s1326_s21 = scalar_lea.vmem %s988_s20, 1024  ;;  %p1331_p7 = scmp.lt.s32.totalorder %s988_s20, %s988_s20 }
  0x4c   :  { %p1327_p6 = scmp.ne.s32.totalorder %s988_s20, %s1326_s21  ;;  %p1332_p8 = scmp.lt.s32.totalorder %s1326_s21, %s1326_s21 }
  0x4d   :  { %1085 = vmatpush3.bf16.msra.mxu0 %v1204_v21 }
  0x4e   :  { %413 = vmatpush1.bf16.msra.mxu1 %v1197_v23  ;;  %1086 = vmatprep.subr.bf16.mxu0 %v1205_v25  ;;  %p1333_p9 = por %p1332_p8, %p1331_p7 }
  0x4f   :  { %414 = vmatprep.subr.bf16.mxu1 %v1199_v24 }
  0x50   :  { %p1334_p10 = pnand %p1333_p9, %p1327_p6 }
  0x51   :  { %1087 = vmatpush3.bf16.msra.mxu0 %v1205_v25 }
  0x52   :  { %415 = vmatpush1.bf16.msra.mxu1 %v1201_v26  ;;  %1088 = vmatprep.subr.bf16.mxu0 %v1207_v28 }
  0x53   :  { %1130 = vmatprep.subr.bf16.mxu1 %v1363_v45 }
  0x55   :  { %433 = vmatmul.mubr.bf16.vlgmr.msra.gmra.mxu1 %v1203_v27  ;;  %1089 = vmatpush3.bf16.msra.mxu0 %v1207_v28 }
  0x56   :  { %442 = vmatprep.mubr.bf16.mxu1 %v1362_v0  ;;  %1098 = vmatprep.subr.bf16.mxu0 %v1363_v45 }
  0x58   :  { %1091 = vmatmul.mubr.bf16.vlgmr.msra.gmra.mxu0 %v89_v33 }
  0x59   :  { %1094 = vmatprep.mubr.bf16.mxu0 %v90_v34 }
  0x5d   :  { %443 = vmatmul.mubr.bf16.gmra.mxu1 %v1206_v35 }
  0x5e   :  { %452 = vmatprep.mubr.bf16.mxu1 %v1362_v0 }
  0x60   :  { %1095 = vmatmul.mubr.bf16.gmra.mxu0 %v91_v38 }
  0x61   :  { %1102 = vmatprep.mubr.msk.bf16.mxu0 %vm1364_vm0, %v1363_v45 }
  0x65   :  { %453 = vmatmul.mubr.bf16.gmra.mxu1 %v1208_v39 }
  0x66   :  { %462 = vmatprep.mubr.bf16.mxu1 %v1362_v0 }
  0x6d   :  { %463 = vmatmul.mubr.bf16.gmra.mxu1 %v1209_v40 }
  0x6e   :  { %472 = vmatprep.mubr.bf16.mxu1 %v1362_v0 }
  0x75   :  { %473 = vmatmul.mubr.bf16.gmra.mxu1 %v1210_v41 }
  0x76   :  { %482 = vmatprep.mubr.bf16.mxu1 %v1362_v0 }
  0x7d   :  { %483 = vmatmul.mubr.bf16.gmra.mxu1 %v1211_v42 }
  0x7e   :  { %492 = vmatprep.mubr.bf16.mxu1 %v1362_v0 }
  0x85   :  { %493 = vmatmul.mubr.bf16.gmra.mxu1 %v1212_v43 }
  0x86   :  { %502 = vmatprep.mubr.bf16.mxu1 %v1362_v0 }
  0x8d   :  { %503 = vmatmul.mubr.bf16.gmra.mxu1 %v1213_v44 }
  0x8e   :  { %1134 = vmatprep.mubr.msk.bf16.mxu1 %vm1364_vm0, %v1363_v45 }
 0x115   :  { %v434_v47 = vpop.f32.mrf.mxu1 }
 0x116   :  { %v435_v12 = vadd.f32 %v434_v47, %v1466_v57 }
 0x117   :  { %v436_v48 = vpop.f32.mrf.mxu1 }
 0x118   :  { %v1092_v58 = vpop.f32.mrf.mxu0  ;;  %v437_v8 = vadd.f32 %v436_v48, %v1468_v60 }
 0x119   :  { %v438_v50 = vpop.f32.mrf.mxu1  ;;  %v206_v48 = vadd.f32 %v1092_v58, %v1487_v16 }
 0x11a   :  { %v197_v3 = vpop.f32.mrf.mxu0  ;;  %v439_v9 = vadd.f32 %v438_v50, %v1466_v57 }
 0x11b   :  { %v440_v51 = vpop.f32.mrf.mxu1  ;;  %v198_v21 = vadd.f32 %v1487_v16, %v197_v3 }
 0x11c   :  { %v441_v5 = vadd.f32 %v440_v51, %v1468_v60  ;;  %v1093_v10 = vpop.f32.mrf.mxu0  ;;  %v513_v15 = vpack.c.bf16 %v439_v9, %v435_v12 }
 0x11d   :  { %v444_v54 = vpop.f32.mrf.mxu1  ;;  %v209_v49 = vadd.f32 %v1093_v10, %v1487_v16 }
 0x11e   :  { %v445_v61 = vadd.f32 %v444_v54, %v1466_v57  ;;  %v521_v13 = vpack.c.bf16 %v441_v5, %v437_v8  ;;  %v200_v17 = vpop.f32.mrf.mxu0 }
 0x11f   :  { %v446_v56 = vpop.f32.mrf.mxu1  ;;  %v201_v22 = vadd.f32 %v1487_v16, %v200_v17 }
 0x120   :  { %v447_v0 = vadd.f32 %v446_v56, %v1468_v60  ;;  %v1096_v52 = vpop.f32.mrf.mxu0  ;;  %v530_v56 = vpack.c.bf16 %v209_v49, %v206_v48 }
 0x121   :  { %v448_v59 = vpop.f32.mrf.mxu1  ;;  %v529_v27 = vpack.c.bf16 %v201_v22, %v198_v21 }
 0x122   :  { %v449_v62 = vadd.f32 %v448_v59, %v1466_v57  ;;  %v213_v58 = vpop.f32.mrf.mxu0 }
 0x123   :  { %v450_v63 = vpop.f32.mrf.mxu1 }
 0x124   :  { %v514_v1 = vpack.c.bf16 %v449_v62, %v445_v61  ;;  %v451_v2 = vadd.f32 %v450_v63, %v1468_v60 }
 0x125   :  { %v454_v4 = vpop.f32.mrf.mxu1 }
 0x126   :  { %v522_v6 = vpack.c.bf16 %v451_v2, %v447_v0  ;;  %1099 = vmatpush3.bf16.xpose.msra.mxu0 %v514_v1  ;;  %v455_v41 = vadd.f32 %v454_v4, %v1466_v57  ;;  %v1097_v4 = vpop.f32.mrf.mxu0 }
 0x127   :  { %v1475_v7 = vpop.f32.mrf.mxu1  ;;  %1100 = vmatprep.subr.bf16.mxu0 %v1363_v45 }
 0x128   :  { %1131 = vmatpush3.bf16.msra.mxu1 %v522_v6  ;;  %v216_v10 = vpop.f32.mrf.mxu0 }
 0x129   :  { %v458_v11 = vpop.f32.mrf.mxu1  ;;  %1132 = vmatprep.subr.bf16.mxu1 %v1363_v45  ;;  %v217_v17 = vadd.f32 %v1487_v16, %v216_v10 }
 0x12a   :  { %v459_v38 = vadd.f32 %v458_v11, %v1466_v57 }
 0x12b   :  { %v1482_v14 = vpop.f32.mrf.mxu1 }
 0x12c   :  { %1133 = vmatpush3.bf16.msra.mxu1 %v521_v13  ;;  %v515_v43 = vpack.c.bf16 %v459_v38, %v455_v41 }
 0x12d   :  { %v464_v18 = vpop.f32.mrf.mxu1  ;;  %1146 = vmatprep.subr.bf16.mxu1 %v1363_v45 }
 0x12e   :  { %1101 = vmatpush3.bf16.xpose.msra.mxu0 %v513_v15  ;;  %v465_v25 = vadd.f32 %v464_v18, %v1466_v57  ;;  %v214_v15 = vadd.f32 %v1487_v16, %v213_v58 }
 0x12f   :  { %v1492_v23 = vpop.f32.mrf.mxu1  ;;  %1106 = vmatprep.subr.bf16.mxu0 %v1363_v45 }
 0x130   :  { %v467_v48 = vadd.f32 %v1492_v23, %v1468_v60 }
 0x131   :  { %v468_v24 = vpop.f32.mrf.mxu1 }
 0x132   :  { %v469_v26 = vadd.f32 %v468_v24, %v1466_v57 }
 0x133   :  { %v1497_v28 = vpop.f32.mrf.mxu1 }
 0x134   :  { %v516_v33 = vpack.c.bf16 %v469_v26, %v465_v25  ;;  %v531_v26 = vpack.c.bf16 %v217_v17, %v214_v15 }
 0x135   :  { %v474_v34 = vpop.f32.mrf.mxu1  ;;  %1103 = vmatmul.mubr.bf16.vlgmr.msra.gmra.mxu0 %v529_v27 }
 0x136   :  { %1107 = vmatpush3.bf16.xpose.msra.mxu0 %v516_v33  ;;  %1110 = vmatprep.mubr.msk.bf16.mxu0 %vm1364_vm0, %v1363_v45  ;;  %v475_v6 = vadd.f32 %v474_v34, %v1466_v57 }
 0x137   :  { %v476_v35 = vpop.f32.mrf.mxu1  ;;  %1108 = vmatprep.subr.bf16.mxu0 %v1363_v45 }
 0x138   :  { %v1504_v39 = vadd.f32 %v476_v35, %v1468_v60 }
 0x139   :  { %v478_v40 = vpop.f32.mrf.mxu1 }
 0x13a   :  { %v479_v2 = vadd.f32 %v478_v40, %v1466_v57 }
 0x13b   :  { %v480_v42 = vpop.f32.mrf.mxu1 }
 0x13c   :  { %v1508_v44 = vadd.f32 %v480_v42, %v1468_v60  ;;  %v517_v9 = vpack.c.bf16 %v479_v2, %v475_v6  ;;  %v222_v42 = vadd.f32 %v1096_v52, %v1487_v16 }
 0x13d   :  { %v484_v46 = vpop.f32.mrf.mxu1 }
 0x13e   :  { %v525_v47 = vpack.c.bf16 %v1508_v44, %v1504_v39  ;;  %1109 = vmatpush3.bf16.xpose.msra.mxu0 %v515_v43  ;;  %v485_v54 = vadd.f32 %v484_v46, %v1466_v57  ;;  %v225_v43 = vadd.f32 %v1097_v4, %v1487_v16  ;;  %v471_v46 = vadd.f32 %v1497_v28, %v1468_v60 }
 0x13f   :  { %v486_v50 = vpop.f32.mrf.mxu1  ;;  %1114 = vmatprep.subr.bf16.mxu0 %v1363_v45 }
 0x140   :  { %v1516_v51 = vadd.f32 %v486_v50, %v1468_v60  ;;  %v532_v49 = vpack.c.bf16 %v225_v43, %v222_v42  ;;  %v461_v50 = vadd.f32 %v1482_v14, %v1468_v60 }
 0x141   :  { %v488_v53 = vpop.f32.mrf.mxu1 }
 0x142   :  { %v489_v55 = vadd.f32 %v488_v53, %v1466_v57  ;;  %v524_v53 = vpack.c.bf16 %v471_v46, %v467_v48 }
 0x143   :  { %v490_v59 = vpop.f32.mrf.mxu1 }
 0x144   :  { %v518_v61 = vpack.c.bf16 %v489_v55, %v485_v54  ;;  %v1521_v62 = vadd.f32 %v490_v59, %v1468_v60 }
 0x145   :  { %v494_v63 = vpop.f32.mrf.mxu1  ;;  %1111 = vmatmul.mubr.bf16.vlgmr.msra.gmra.mxu0 %v530_v56 }
 0x146   :  { %v526_v0 = vpack.c.bf16 %v1521_v62, %v1516_v51  ;;  %1115 = vmatpush3.bf16.xpose.msra.mxu0 %v518_v61  ;;  %1118 = vmatprep.mubr.msk.bf16.mxu0 %vm1364_vm0, %v1363_v45  ;;  %v495_v40 = vadd.f32 %v494_v63, %v1466_v57 }
 0x147   :  { %v496_v1 = vpop.f32.mrf.mxu1  ;;  %1116 = vmatprep.subr.bf16.mxu0 %v1363_v45 }
 0x148   :  { %v1530_v3 = vadd.f32 %v496_v1, %v1468_v60 }
 0x149   :  { %v498_v5 = vpop.f32.mrf.mxu1 }
 0x14a   :  { %v499_v38 = vadd.f32 %v498_v5, %v1466_v57 }
 0x14b   :  { %v500_v8 = vpop.f32.mrf.mxu1 }
 0x14c   :  { %v1534_v11 = vadd.f32 %v500_v8, %v1468_v60  ;;  %v519_v41 = vpack.c.bf16 %v499_v38, %v495_v40 }
 0x14d   :  { %v504_v12 = vpop.f32.mrf.mxu1 }
 0x14e   :  { %v527_v13 = vpack.c.bf16 %v1534_v11, %v1530_v3  ;;  %1117 = vmatpush3.bf16.xpose.msra.mxu0 %v517_v9  ;;  %v505_v24 = vadd.f32 %v504_v12, %v1466_v57 }
 0x14f   :  { %v506_v18 = vpop.f32.mrf.mxu1  ;;  %1122 = vmatprep.subr.bf16.mxu0 %v1363_v45 }
 0x150   :  { %v1542_v21 = vadd.f32 %v506_v18, %v1468_v60 }
 0x151   :  { %v508_v22 = vpop.f32.mrf.mxu1 }
 0x152   :  { %v509_v25 = vadd.f32 %v508_v22, %v1466_v57  ;;  %v457_v57 = vadd.f32 %v1475_v7, %v1468_v60 }
 0x153   :  { %v510_v27 = vpop.f32.mrf.mxu1 }
 0x154   :  { %v520_v33 = vpack.c.bf16 %v509_v25, %v505_v24  ;;  %v1547_v34 = vadd.f32 %v510_v27, %v1468_v60  ;;  %v523_v16 = vpack.c.bf16 %v461_v50, %v457_v57 }
 0x155   :  { %1119 = vmatmul.mubr.bf16.vlgmr.msra.gmra.mxu0 %v531_v26 }
 0x156   :  { %v528_v35 = vpack.c.bf16 %v1547_v34, %v1542_v21  ;;  %1123 = vmatpush3.bf16.xpose.msra.mxu0 %v520_v33  ;;  %1126 = vmatprep.mubr.msk.bf16.mxu0 %vm1364_vm0, %v1363_v45 }
 0x157   :  { %1124 = vmatprep.subr.bf16.mxu0 %v1363_v45 }
 0x15e   :  { %1125 = vmatpush3.bf16.xpose.msra.mxu0 %v519_v41 }
 0x15f   :  { %1138 = vmatprep.subr.bf16.mxu0 %v1363_v45 }
 0x165   :  { %1127 = vmatmul.mubr.bf16.vlgmr.msra.gmra.mxu0 %v532_v49 }
 0x166   :  { %1139 = vmatpush3.bf16.msra.mxu0 %v524_v53  ;;  %1142 = vmatprep.mubr.msk.bf16.mxu0 %vm1364_vm0, %v1363_v45 }
 0x167   :  { %1140 = vmatprep.subr.bf16.mxu0 %v1363_v45 }
 0x16a   :  { %1141 = vmatpush3.bf16.msra.mxu0 %v523_v16 }
 0x16b   :  { %1154 = vmatprep.subr.bf16.mxu0 %v1363_v45 }
 0x1f5   :  { %v567_v23 = vpop.f32.mrf.mxu0 }
 0x1f6   :  { %v698_v28 = vsel %vm697_vm1, %v567_v23, -inf }
 0x1f7   :  { %699 = vmax.xlane.f32.xlu0 %v698_v28  ;;  %v1104_v14 = vpop.f32.mrf.mxu0 }
 0x1f9   :  { %v570_v52 = vpop.f32.mrf.mxu0 }
 0x1fa   :  { %v701_v54 = vsel %vm697_vm1, %v570_v52, -inf }
 0x1fb   :  { %702 = vmax.xlane.f32.xlu0 %v701_v54  ;;  %v1105_v60 = vpop.f32.mrf.mxu0 }
 0x205   :  { %v608_v7 = vpop.f32.mrf.mxu0 }
 0x206   :  { %v704_v55 = vsel %vm697_vm1, %v608_v7, -inf }
 0x207   :  { %705 = vmax.xlane.f32.xlu1 %v704_v55  ;;  %v1112_v56 = vpop.f32.mrf.mxu0 }
 0x209   :  { %v611_v59 = vpop.f32.mrf.mxu0 }
 0x20a   :  { %v707_v61 = vsel %vm697_vm1, %v611_v59, -inf }
 0x20b   :  { %708 = vmax.xlane.f32.xlu1 %v707_v61  ;;  %v1113_v58 = vpop.f32.mrf.mxu0 }
 0x215   :  { %v649_v63 = vpop.f32.mrf.mxu0 }
 0x216   :  { %v710_v1 = vsel %vm697_vm1, %v649_v63, -inf }
 0x217   :  { %711 = vmax.xlane.f32.xlu0 %v710_v1  ;;  %v1120_v2 = vpop.f32.mrf.mxu0 }
 0x219   :  { %v652_v4 = vpop.f32.mrf.mxu0 }
 0x21a   :  { %v713_v5 = vsel %vm697_vm1, %v652_v4, -inf }
 0x21b   :  { %714 = vmax.xlane.f32.xlu1 %v713_v5  ;;  %v1121_v6 = vpop.f32.mrf.mxu0 }
 0x225   :  { %v690_v8 = vpop.f32.mrf.mxu0 }
 0x226   :  { %v716_v9 = vsel %vm697_vm1, %v690_v8, -inf }
 0x227   :  { %717 = vmax.xlane.f32.xlu0 %v716_v9  ;;  %v1128_v10 = vpop.f32.mrf.mxu0 }
 0x229   :  { %v693_v12 = vpop.f32.mrf.mxu0 }
 0x22a   :  { %v719_v15 = vsel %vm697_vm1, %v693_v12, -inf }
 0x22b   :  { %720 = vmax.xlane.f32.xlu1 %v719_v15  ;;  %v1129_v17 = vpop.f32.mrf.mxu0 }
 0x280   :  { %v700_v18 = vpop.xlane.xlu0 %699 }
 0x281   :  { %v722_v22 = vsub.f32 %v567_v23, %v700_v18 }
 0x283   :  { %v730_v24 = vmul.f32 1.442695, %v722_v22 }
 0x284   :  { %v703_v25 = vpop.xlane.xlu0 %702 }
 0x285   :  { %1214 = vpow2.f32 %v730_v24  ;;  %v723_v26 = vsub.f32 %v570_v52, %v703_v25 }
 0x287   :  { %v732_v27 = vmul.f32 1.442695, %v723_v26 }
 0x289   :  { %1216 = vpow2.f32 %v732_v27 }
 0x290   :  { %v706_v33 = vpop.xlane.xlu1 %705 }
 0x291   :  { %v724_v38 = vsub.f32 %v608_v7, %v706_v33 }
 0x292   :  { %v1215_v40 = vpop.eup %1214 }
 0x293   :  { %v734_v41 = vmul.f32 1.442695, %v724_v38  ;;  %v746_v42 = vsel %vm697_vm1, %v1215_v40, 0.0 }
 0x294   :  { %v709_v43 = vpop.xlane.xlu1 %708  ;;  %747 = vadd.xlane.f32.xlu0 %v746_v42 }
 0x295   :  { %1218 = vpow2.f32 %v734_v41  ;;  %v725_v46 = vsub.f32 %v611_v59, %v709_v43 }
 0x296   :  { %v1217_v48 = vpop.eup %1216 }
 0x297   :  { %v770_v49 = vpack.c.bf16 %v1217_v48, %v1215_v40  ;;  %v736_v50 = vmul.f32 1.442695, %v725_v46  ;;  %v749_v53 = vsel %vm697_vm1, %v1217_v48, 0.0 }
 0x298   :  { %750 = vadd.xlane.f32.xlu1 %v749_v53 }
 0x299   :  { %1220 = vpow2.f32 %v736_v50  ;;  %1135 = vmatmul.mubr.msk.bf16.vlgmr.msra.gmra.mxu1 %vm697_vm1, %v770_v49 }
 0x29a   :  { %1147 = vmatpush3.bf16.msra.mxu1 %v526_v0  ;;  %1150 = vmatprep.mubr.msk.bf16.mxu1 %vm1364_vm0, %v1363_v45 }
 0x29b   :  { %1148 = vmatprep.subr.bf16.mxu1 %v1363_v45 }
 0x29e   :  { %1149 = vmatpush3.bf16.msra.mxu1 %v525_v47 }
 0x2a0   :  { %v712_v57 = vpop.xlane.xlu0 %711 }
 0x2a1   :  { %v726_v16 = vsub.f32 %v649_v63, %v712_v57 }
 0x2a2   :  { %v1219_v23 = vpop.eup %1218 }
 0x2a3   :  { %v738_v28 = vmul.f32 1.442695, %v726_v16  ;;  %v752_v14 = vsel %vm697_vm1, %v1219_v23, 0.0 }
 0x2a4   :  { %v715_v52 = vpop.xlane.xlu1 %714  ;;  %753 = vadd.xlane.f32.xlu0 %v752_v14 }
 0x2a5   :  { %1222 = vpow2.f32 %v738_v28  ;;  %v727_v51 = vsub.f32 %v652_v4, %v715_v52 }
 0x2a6   :  { %v1221_v62 = vpop.eup %1220 }
 0x2a7   :  { %v740_v0 = vmul.f32 1.442695, %v727_v51  ;;  %v755_v54 = vsel %vm697_vm1, %v1221_v62, 0.0  ;;  %v771_v60 = vpack.c.bf16 %v1221_v62, %v1219_v23 }
 0x2a8   :  { %756 = vadd.xlane.f32.xlu1 %v755_v54 }
 0x2a9   :  { %1224 = vpow2.f32 %v740_v0  ;;  %1143 = vmatmul.mubr.msk.bf16.vlgmr.msra.gmra.mxu0 %vm697_vm1, %v771_v60 }
 0x2aa   :  { %1155 = vmatpush3.bf16.msra.mxu0 %v528_v35  ;;  %1158 = vmatprep.mubr.msk.bf16.mxu0 %vm1364_vm0, %v1363_v45 }
 0x2ab   :  { %1156 = vmatprep.subr.bf16.mxu0 %v1363_v45 }
 0x2ae   :  { %1157 = vmatpush3.bf16.msra.mxu0 %v527_v13 }
 0x2b0   :  { %v718_v39 = vpop.xlane.xlu0 %717 }
 0x2b1   :  { %v728_v44 = vsub.f32 %v690_v8, %v718_v39 }
 0x2b2   :  { %v1223_v47 = vpop.eup %1222 }
 0x2b3   :  { %v742_v7 = vmul.f32 1.442695, %v728_v44  ;;  %v758_v55 = vsel %vm697_vm1, %v1223_v47, 0.0 }
 0x2b4   :  { %759 = vadd.xlane.f32.xlu0 %v758_v55  ;;  %v721_v56 = vpop.xlane.xlu1 %720 }
 0x2b5   :  { %1226 = vpow2.f32 %v742_v7  ;;  %v729_v21 = vsub.f32 %v693_v12, %v721_v56 }
 0x2b6   :  { %v1225_v34 = vpop.eup %1224 }
 0x2b7   :  { %v744_v35 = vmul.f32 1.442695, %v729_v21  ;;  %v761_v59 = vsel %vm697_vm1, %v1225_v34, 0.0  ;;  %v772_v61 = vpack.c.bf16 %v1225_v34, %v1223_v47 }
 0x2b8   :  { %762 = vadd.xlane.f32.xlu1 %v761_v59 }
 0x2b9   :  { %1228 = vpow2.f32 %v744_v35  ;;  %1151 = vmatmul.mubr.msk.bf16.vlgmr.msra.gmra.mxu1 %vm697_vm1, %v772_v61 }
 0x2c2   :  { %v1227_v45 = vpop.eup %1226 }
 0x2c3   :  { %v764_v3 = vsel %vm697_vm1, %v1227_v45, 0.0 }
 0x2c4   :  { %765 = vadd.xlane.f32.xlu0 %v764_v3 }
 0x2c6   :  { %v1229_v11 = vpop.eup %1228 }
 0x2c7   :  { %v767_v13 = vsel %vm697_vm1, %v1229_v11, 0.0  ;;  %v773_v58 = vpack.c.bf16 %v1229_v11, %v1227_v45 }
 0x2c8   :  { %768 = vadd.xlane.f32.xlu1 %v767_v13 }
 0x2c9   :  { %1159 = vmatmul.mubr.msk.bf16.vlgmr.msra.gmra.mxu0 %vm697_vm1, %v773_v58 }
 0x31d   :  { %v748_v63 = vpop.xlane.xlu0 %747 }
 0x31e   :  { %1230 = vrcp.f32 %v748_v63 }
 0x321   :  { %v751_v1 = vpop.xlane.xlu1 %750 }
 0x322   :  { %1232 = vrcp.f32 %v751_v1 }
 0x32b   :  { %v1231_v2 = vpop.eup %1230 }
 0x32d   :  { %v754_v4 = vpop.xlane.xlu0 %753 }
 0x32e   :  { %1234 = vrcp.f32 %v754_v4 }
 0x32f   :  { %v1233_v10 = vpop.eup %1232 }
 0x331   :  { %v757_v12 = vpop.xlane.xlu1 %756 }
 0x332   :  { %1236 = vrcp.f32 %v757_v12 }
 0x33b   :  { %v1235_v24 = vpop.eup %1234 }
 0x33d   :  { %v760_v25 = vpop.xlane.xlu0 %759 }
 0x33e   :  { %1238 = vrcp.f32 %v760_v25 }
 0x33f   :  { %v1237_v40 = vpop.eup %1236 }
 0x34d   :  { %v766_v48 = vpop.xlane.xlu0 %765 }
 0x359   :  { %v811_v5 = vpop.f32.mrf.mxu1 }
 0x35a   :  { %v958_v6 = vmul.f32 %v1231_v2, %v811_v5 }
 0x35b   :  { %v1136_v8 = vpop.f32.mrf.mxu1 }
 0x35c   :  { %v966_v9 = vadd.f32 %v958_v6, %v1426_v19  ;;  %v763_v19 = vpop.xlane.xlu1 %762 }
 0x35d   :  { %v814_v15 = vpop.f32.mrf.mxu1  ;;  %1240 = vrcp.f32 %v763_v19 }
 0x35e   :  { %974 = vst [vmem:[#allocation10] sm:$0xff] %v966_v9  ;;  %v959_v17 = vmul.f32 %v1233_v10, %v814_v15  ;;  %1242 = vrcp.f32 %v766_v48 }
 0x35f   :  { %v1137_v18 = vpop.f32.mrf.mxu1 }
 0x360   :  { %v967_v22 = vadd.f32 %v959_v17, %v1428_v20  ;;  %v1239_v20 = vpop.eup %1238 }
 0x362   :  { %975 = vst [vmem:[#allocation10 + $0x8] sm:$0xff] %v967_v22 }
 0x369   :  { %v855_v26 = vpop.f32.mrf.mxu0 }
 0x36a   :  { %v960_v27 = vmul.f32 %v1235_v24, %v855_v26  ;;  %v1241_v16 = vpop.eup %1240 }
 0x36b   :  { %v1144_v33 = vpop.f32.mrf.mxu0 }
 0x36c   :  { %v968_v38 = vadd.f32 %v960_v27, %v1432_v29  ;;  %v769_v29 = vpop.xlane.xlu1 %768 }
 0x36d   :  { %v858_v41 = vpop.f32.mrf.mxu0  ;;  %1244 = vrcp.f32 %v769_v29 }
 0x36e   :  { %976 = vst [vmem:[#allocation10 + $0x10] sm:$0xff] %v968_v38  ;;  %v961_v42 = vmul.f32 %v1237_v40, %v858_v41 }
 0x36f   :  { %v1145_v43 = vpop.f32.mrf.mxu0 }
 0x370   :  { %v969_v46 = vadd.f32 %v961_v42, %v1434_v30  ;;  %v1243_v30 = vpop.eup %1242 }
 0x372   :  { %977 = vst [vmem:[#allocation10 + $0x18] sm:$0xff] %v969_v46 }
 0x379   :  { %v899_v49 = vpop.f32.mrf.mxu1 }
 0x37a   :  { %v962_v50 = vmul.f32 %v1239_v20, %v899_v49  ;;  %v1245_v60 = vpop.eup %1244 }
 0x37b   :  { %v1152_v53 = vpop.f32.mrf.mxu1 }
 0x37c   :  { %v970_v57 = vadd.f32 %v962_v50, %v1436_v31 }
 0x37d   :  { %v902_v23 = vpop.f32.mrf.mxu1 }
 0x37e   :  { %978 = vst [vmem:[#allocation10 + $0x20] sm:$0xff] %v970_v57  ;;  %v963_v28 = vmul.f32 %v1241_v16, %v902_v23 }
 0x37f   :  { %v1153_v14 = vpop.f32.mrf.mxu1 }
 0x380   :  { %v971_v52 = vadd.f32 %v963_v28, %v1438_v32 }
 0x382   :  { %979 = vst [vmem:[#allocation10 + $0x28] sm:$0xff] %v971_v52 }
 0x389   :  { %v943_v51 = vpop.f32.mrf.mxu0 }
 0x38a   :  { %v964_v62 = vmul.f32 %v1243_v30, %v943_v51 }
 0x38b   :  { %v1160_v0 = vpop.f32.mrf.mxu0 }
 0x38c   :  { %v972_v54 = vadd.f32 %v964_v62, %v1445_v36 }
 0x38d   :  { %v946_v39 = vpop.f32.mrf.mxu0 }
 0x38e   :  { %980 = vst [vmem:[#allocation10 + $0x30] sm:$0xff] %v972_v54  ;;  %v965_v31 = vmul.f32 %v1245_v60, %v946_v39 }
 0x38f   :  { %v1161_v44 = vpop.f32.mrf.mxu0 }
 0x390   :  { %v973_v47 = vadd.f32 %v965_v31, %v1447_v37 }
 0x392   :  { %981 = vst [vmem:[#allocation10 + $0x38] sm:$0xff] %v973_v47 }
 0x393   :  { %1337 = shalt.err (!%p1334_p10)
}
 0x394   :  { %993 = dma.vmem_to_hbm [thread:$0]  %s988_s20, 1024, %s1629_s6, [#allocation4], %s1358_s7, %s1358_s7, %s1359_s8  }
 0x395   :  { %1352 = dma.done.wait [#allocation4], 1024  }
 0x396   :  { %1353 = vsyncadd [#allocation4], 4294966272 }
 0x397   :  { %997 = vsyncpa [#allocation3], 1 }
 0x398   :  { %998 = vsyncpa [#allocation6], 1 }
 0x399   :  { %999 = vsyncpa [#allocation9], 1 }
 0x39a   :  { %1000 = vsyncpa [#allocation4], 1 }

// kernel: tpu_custom_call.1
= control target key start
LH: loop header
LB: loop body
LE: loop exit
PB: predicated region body
PF: predicated region fallthrough
CT: control target
= control target key end

     0   :  { %11 = vsyncpa [#allocation3], 0  ;;  %s1623_s0 = inlined_call_operand.hbm [shape: f32[4,16,128], index: 0, kind: input, shape index: {}]   ;;  %s1624_s1 = inlined_call_operand.hbm [shape: bf16[4,32,128], index: 1, kind: input, shape index: {}]   ;;  %s1625_s2 = inlined_call_operand.hbm [shape: bf16[128,128], index: 2, kind: input, shape index: {}]   ;;  %s1626_s3 = inlined_call_operand.vmem [shape: f32[1,128], index: 3, kind: input, shape index: {}]   ;;  %s1627_s4 = inlined_call_operand.hbm [shape: bf16[128,256], index: 4, kind: input, shape index: {}]   ;;  %s1628_s5 = inlined_call_operand.vmem [shape: f32[1,256], index: 5, kind: input, shape index: {}]   ;;  %s1629_s6 = inlined_call_operand.hbm [shape: f32[4,16,128], index: 6, kind: output, shape index: {}]  }
   0x1   :  { %12 = vsyncpa [#allocation6], 0 }
   0x2   :  { %13 = vsyncpa [#allocation9], 0 }
   0x3   :  { %14 = vsyncpa [#allocation4], 0  ;;  %s1354_s21 = smov [#allocation5]  }
   0x4   :  { %s32_s22 = sshll.u32 %s1354_s21, 4  ;;  %s33_s22 = int_to_ptr.vmem [resolvable:$true] %s32_s22 }
   0x5   :  { %s1254_s23 = scalar_lea.vmem %s33_s22, 1024  ;;  %p1259_p1 = scmp.lt.s32.totalorder %s33_s22, %s33_s22 }
   0x6   :  { %p1255_p0 = scmp.ne.s32.totalorder %s33_s22, %s1254_s23  ;;  %p1260_p2 = scmp.lt.s32.totalorder %s1254_s23, %s1254_s23 }
   0x8   :  { %p1261_p3 = por %p1260_p2, %p1259_p1 }
   0xa   :  { %p1262_p4 = pnand %p1261_p3, %p1255_p0 }
   0xc   :  { %1265 = shalt.err (!%p1262_p4)
}
   0xd   :  { %s1355_s24 = smov 64   ;;  %s1356_s25 = smov 4  }
   0xe   :  { %38 = dma.hbm_to_vmem [thread:$0]  %s1624_s1, 1024, %s33_s22, [#allocation6], %s1355_s24, %s1355_s24, %s1356_s25  }
   0xf   :  { %s1357_s28 = smov [#allocation2]  }
  0x10   :  { %s20_s29 = sshll.u32 %s1357_s28, 4  ;;  %s21_s29 = int_to_ptr.vmem [resolvable:$true] %s20_s29 }
  0x11   :  { %s1274_s30 = scalar_lea.vmem %s21_s29, 1024  ;;  %p1279_p6 = scmp.lt.s32.totalorder %s21_s29, %s21_s29 }
  0x12   :  { %p1275_p5 = scmp.ne.s32.totalorder %s21_s29, %s1274_s30  ;;  %p1280_p7 = scmp.lt.s32.totalorder %s1274_s30, %s1274_s30 }
  0x14   :  { %p1281_p8 = por %p1280_p7, %p1279_p6 }
  0x16   :  { %p1282_p9 = pnand %p1281_p8, %p1275_p5 }
  0x18   :  { %1285 = shalt.err (!%p1282_p9)
}
  0x19   :  { %s1358_s7 = smov 128   ;;  %s1359_s8 = smov 8  }
  0x1a   :  { %26 = dma.hbm_to_vmem [thread:$0]  %s1623_s0, 1024, %s21_s29, [#allocation3], %s1358_s7, %s1358_s7, %s1359_s8  }
  0x1b   :  { %s1360_s1 = smov [#allocation7]   ;;  %s1361_s12 = smov [#allocation8]  }
  0x1c   :  { %s44_s11 = sshll.u32 %s1360_s1, 4  ;;  %s58_s13 = sshll.u32 %s1361_s12, 4  ;;  %s45_s11 = int_to_ptr.vmem [resolvable:$true] %s44_s11  ;;  %s59_s13 = int_to_ptr.vmem [resolvable:$true] %s58_s13 }
  0x1d   :  { %s1294_s14 = scalar_lea.vmem %s45_s11, 1024  ;;  %p1299_p11 = scmp.lt.s32.totalorder %s45_s11, %s45_s11 }
  0x1e   :  { %p1295_p10 = scmp.ne.s32.totalorder %s45_s11, %s1294_s14  ;;  %p1300_p12 = scmp.lt.s32.totalorder %s1294_s14, %s1294_s14 }
  0x20   :  { %p1301_p13 = por %p1300_p12, %p1299_p11 }
  0x22   :  { %p1302_p0 = pnand %p1301_p13, %p1295_p10 }
  0x24   :  { %1305 = shalt.err (!%p1302_p0)
}
  0x25   :  { %50 = dma.hbm_to_vmem [thread:$0]  %s1625_s2, 1024, %s45_s11, [#allocation6], %s1355_s24, %s1355_s24, %s1356_s25  }
  0x26   :  { %s1314_s0 = scalar_lea.vmem %s59_s13, 2048  ;;  %p1319_p2 = scmp.lt.s32.totalorder %s59_s13, %s59_s13 }
  0x27   :  { %p1315_p1 = scmp.ne.s32.totalorder %s59_s13, %s1314_s0  ;;  %p1320_p3 = scmp.lt.s32.totalorder %s1314_s0, %s1314_s0 }
  0x29   :  { %p1321_p4 = por %p1320_p3, %p1319_p2 }
  0x2b   :  { %p1322_p5 = pnand %p1321_p4, %p1315_p1 }
  0x2d   :  { %1325 = shalt.err (!%p1322_p5)
}
  0x2e   :  { %64 = dma.hbm_to_vmem [thread:$0]  %s1627_s4, 2048, %s59_s13, [#allocation9], %s1358_s7, %s1358_s7, %s1359_s8  }
  0x2f   :  { %1346 = dma.done.wait [#allocation3], 1024  }
  0x30   :  { %1347 = vsyncadd [#allocation3], 4294966272 }
  0x31   :  { %1348 = dma.done.wait [#allocation6], 2048  }
  0x32   :  { %1349 = vsyncadd [#allocation6], 4294965248 }
  0x33   :  { %1350 = dma.done.wait [#allocation9], 2048  }
  0x34   :  { %1351 = vsyncadd [#allocation9], 4294965248  ;;  %v1362_v0 = vmov 0   ;;  %v1174_v1 = vld [vmem:[#allocation8 + $0x74] ss:$8 sps:$4 sm:$0xff]   ;;  %v1194_v10 = vld [vmem:[#allocation7 + $0x28] sm:$0xff]   ;;  %v262_v46 = vlaneseq }
  0x35   :  { %432 = vmatprep.mubr.bf16.mxu1 %v1362_v0  ;;  %v1176_v2 = vld [vmem:[#allocation8 + $0x70] ss:$8 sps:$4 sm:$0xff]   ;;  %400 = vmatprep.subr.bf16.mxu1 %v1174_v1  ;;  %v1177_v3 = vld [vmem:[#allocation8 + $0x64] ss:$8 sps:$4 sm:$0xff]   ;;  %v1179_v4 = vld [vmem:[#allocation8 + $0x60] ss:$8 sps:$4 sm:$0xff]  }
  0x36   :  { %401 = vmatpush1.bf16.msra.mxu1 %v1176_v2  ;;  %v1180_v5 = vld [vmem:[#allocation8 + $0x54] ss:$8 sps:$4 sm:$0xff]   ;;  %v1182_v7 = vld [vmem:[#allocation8 + $0x50] ss:$8 sps:$4 sm:$0xff]   ;;  %v1183_v8 = vld [vmem:[#allocation8 + $0x44] ss:$8 sps:$4 sm:$0xff]  }
  0x37   :  { %402 = vmatprep.subr.bf16.mxu1 %v1177_v3  ;;  %v1186_v6 = vld [vmem:[#allocation7 + $0x38] sm:$0xff]   ;;  %v1190_v9 = vld [vmem:[#allocation7 + $0x30] sm:$0xff]   ;;  %v1185_v11 = vld [vmem:[#allocation8 + $0x40] ss:$8 sps:$4 sm:$0xff]   ;;  %v1363_v45 = vmov 0.0   ;;  %vm1364_vm0 = vmmov 0  }
  0x38   :  { %1074 = vmatprep.subr.bf16.mxu0 %v1186_v6  ;;  %v1187_v12 = vld [vmem:[#allocation8 + $0x34] ss:$8 sps:$4 sm:$0xff]   ;;  %v1198_v13 = vld [vmem:[#allocation7 + $0x20] sm:$0xff]   ;;  %v1189_v14 = vld [vmem:[#allocation8 + $0x30] ss:$8 sps:$4 sm:$0xff]   ;;  %v263_v49 = vshrl.u32 %v262_v46, 7 }
  0x39   :  { %1075 = vmatpush3.bf16.msra.mxu0 %v1186_v6  ;;  %v1191_v15 = vld [vmem:[#allocation8 + $0x24] ss:$8 sps:$4 sm:$0xff]   ;;  %v1202_v16 = vld [vmem:[#allocation7 + $0x18] sm:$0xff]   ;;  %v1193_v17 = vld [vmem:[#allocation8 + $0x20] ss:$8 sps:$4 sm:$0xff]   ;;  %vm697_vm1 = vcmask 261120  }
  0x3a   :  { %403 = vmatpush1.bf16.msra.mxu1 %v1179_v4  ;;  %1076 = vmatprep.subr.bf16.mxu0 %v1190_v9  ;;  %v1195_v18 = vld [vmem:[#allocation8 + $0x14] ss:$8 sps:$4 sm:$0xff]   ;;  %v1426_v19 = vld [vmem:[#allocation2] sm:$0xff]  ;;  %v1428_v20 = vld [vmem:[#allocation2 + $0x8] sm:$0xff]  ;;  %v264_v52 = vsub.s32 0, %v263_v49  ;;  %v268_v55 = vsub.s32 1, %v263_v49 }
  0x3b   :  { %404 = vmatprep.subr.bf16.mxu1 %v1180_v5  ;;  %v1204_v21 = vld [vmem:[#allocation7 + $0x10] sm:$0xff]   ;;  %v88_v22 = vpack.c.bf16 %v1428_v20, %v1426_v19  ;;  %v1199_v24 = vld [vmem:[#allocation8 + $0x4] ss:$8 sps:$4 sm:$0xff]   ;;  %v1201_v26 = vld [vmem:[#allocation8] ss:$8 sps:$4 sm:$0xff]  }
  0x3c   :  { %v1197_v23 = vld [vmem:[#allocation8 + $0x10] ss:$8 sps:$4 sm:$0xff]   ;;  %v1205_v25 = vld [vmem:[#allocation7 + $0x8] sm:$0xff]   ;;  %v1203_v27 = vld [vmem:[#allocation5] sm:$0xff]  }
  0x3d   :  { %1077 = vmatpush3.bf16.msra.mxu0 %v1190_v9  ;;  %1090 = vmatprep.mubr.bf16.mxu0 %v88_v22  ;;  %v1207_v28 = vld [vmem:[#allocation7] sm:$0xff]   ;;  %v1432_v29 = vld [vmem:[#allocation2 + $0x10] sm:$0xff]  ;;  %v1434_v30 = vld [vmem:[#allocation2 + $0x18] sm:$0xff] }
  0x3e   :  { %405 = vmatpush1.bf16.msra.mxu1 %v1182_v7  ;;  %1078 = vmatprep.subr.bf16.mxu0 %v1194_v10  ;;  %v1436_v31 = vld [vmem:[#allocation2 + $0x20] sm:$0xff]  ;;  %v1438_v32 = vld [vmem:[#allocation2 + $0x28] sm:$0xff]  ;;  %v89_v33 = vpack.c.bf16 %v1434_v30, %v1432_v29  ;;  %v1445_v36 = vld [vmem:[#allocation2 + $0x30] sm:$0xff] }
  0x3f   :  { %406 = vmatprep.subr.bf16.mxu1 %v1183_v8  ;;  %v90_v34 = vpack.c.bf16 %v1438_v32, %v1436_v31  ;;  %v1206_v35 = vld [vmem:[#allocation5 + $0x8] sm:$0xff]   ;;  %v1447_v37 = vld [vmem:[#allocation2 + $0x38] sm:$0xff]  ;;  %v1208_v39 = vld [vmem:[#allocation5 + $0x10] sm:$0xff]  }
  0x40   :  { %v91_v38 = vpack.c.bf16 %v1447_v37, %v1445_v36  ;;  %v1209_v40 = vld [vmem:[#allocation5 + $0x18] sm:$0xff]   ;;  %v1210_v41 = vld [vmem:[#allocation5 + $0x20] sm:$0xff]   ;;  %v1211_v42 = vld [vmem:[#allocation5 + $0x28] sm:$0xff]  }
  0x41   :  { %1079 = vmatpush3.bf16.msra.mxu0 %v1194_v10  ;;  %v1212_v43 = vld [vmem:[#allocation5 + $0x30] sm:$0xff]   ;;  %v1213_v44 = vld [vmem:[#allocation5 + $0x38] sm:$0xff]   ;;  %v260_v53 = vld [vmem:[%s1628_s5] sm:$0x3] }
  0x42   :  { %407 = vmatpush1.bf16.msra.mxu1 %v1185_v11  ;;  %1080 = vmatprep.subr.bf16.mxu0 %v1198_v13  ;;  %v1466_v57 = vrot.slane %v260_v53, %v264_v52  ;;  %v1468_v60 = vrot.slane %v260_v53, %v268_v55 }
  0x43   :  { %408 = vmatprep.subr.bf16.mxu1 %v1187_v12 }
  0x45   :  { %1081 = vmatpush3.bf16.msra.mxu0 %v1198_v13 }
  0x46   :  { %409 = vmatpush1.bf16.msra.mxu1 %v1189_v14  ;;  %1082 = vmatprep.subr.bf16.mxu0 %v1202_v16 }
  0x47   :  { %410 = vmatprep.subr.bf16.mxu1 %v1191_v15 }
  0x49   :  { %1083 = vmatpush3.bf16.msra.mxu0 %v1202_v16  ;;  %v1487_v16 = vld [vmem:[%s1626_s3] ss:$0 sm:$0xff]  ;;  %s1365_s3 = smov [#allocation10]  }
  0x4a   :  { %411 = vmatpush1.bf16.msra.mxu1 %v1193_v17  ;;  %1084 = vmatprep.subr.bf16.mxu0 %v1204_v21  ;;  %s987_s20 = sshll.u32 %s1365_s3, 4  ;;  %s988_s20 = int_to_ptr.vmem [resolvable:$true] %s987_s20 }
  0x4b   :  { %412 = vmatprep.subr.bf16.mxu1 %v1195_v18  ;;  %s1326_s21 = scalar_lea.vmem %s988_s20, 1024  ;;  %p1331_p7 = scmp.lt.s32.totalorder %s988_s20, %s988_s20 }
  0x4c   :  { %p1327_p6 = scmp.ne.s32.totalorder %s988_s20, %s1326_s21  ;;  %p1332_p8 = scmp.lt.s32.totalorder %s1326_s21, %s1326_s21 }
  0x4d   :  { %1085 = vmatpush3.bf16.msra.mxu0 %v1204_v21 }
  0x4e   :  { %413 = vmatpush1.bf16.msra.mxu1 %v1197_v23  ;;  %1086 = vmatprep.subr.bf16.mxu0 %v1205_v25  ;;  %p1333_p9 = por %p1332_p8, %p1331_p7 }
  0x4f   :  { %414 = vmatprep.subr.bf16.mxu1 %v1199_v24 }
  0x50   :  { %p1334_p10 = pnand %p1333_p9, %p1327_p6 }
  0x51   :  { %1087 = vmatpush3.bf16.msra.mxu0 %v1205_v25 }
  0x52   :  { %415 = vmatpush1.bf16.msra.mxu1 %v1201_v26  ;;  %1088 = vmatprep.subr.bf16.mxu0 %v1207_v28 }
  0x53   :  { %1130 = vmatprep.subr.bf16.mxu1 %v1363_v45 }
  0x55   :  { %433 = vmatmul.mubr.bf16.vlgmr.msra.gmra.mxu1 %v1203_v27  ;;  %1089 = vmatpush3.bf16.msra.mxu0 %v1207_v28 }
  0x56   :  { %442 = vmatprep.mubr.bf16.mxu1 %v1362_v0  ;;  %1098 = vmatprep.subr.bf16.mxu0 %v1363_v45 }
  0x58   :  { %1091 = vmatmul.mubr.bf16.vlgmr.msra.gmra.mxu0 %v89_v33 }
  0x59   :  { %1094 = vmatprep.mubr.bf16.mxu0 %v90_v34 }
  0x5d   :  { %443 = vmatmul.mubr.bf16.gmra.mxu1 %v1206_v35 }
  0x5e   :  { %452 = vmatprep.mubr.bf16.mxu1 %v1362_v0 }
  0x60   :  { %1095 = vmatmul.mubr.bf16.gmra.mxu0 %v91_v38 }
  0x61   :  { %1102 = vmatprep.mubr.msk.bf16.mxu0 %vm1364_vm0, %v1363_v45 }
  0x65   :  { %453 = vmatmul.mubr.bf16.gmra.mxu1 %v1208_v39 }
  0x66   :  { %462 = vmatprep.mubr.bf16.mxu1 %v1362_v0 }
  0x6d   :  { %463 = vmatmul.mubr.bf16.gmra.mxu1 %v1209_v40 }
  0x6e   :  { %472 = vmatprep.mubr.bf16.mxu1 %v1362_v0 }
  0x75   :  { %473 = vmatmul.mubr.bf16.gmra.mxu1 %v1210_v41 }
  0x76   :  { %482 = vmatprep.mubr.bf16.mxu1 %v1362_v0 }
  0x7d   :  { %483 = vmatmul.mubr.bf16.gmra.mxu1 %v1211_v42 }
  0x7e   :  { %492 = vmatprep.mubr.bf16.mxu1 %v1362_v0 }
  0x85   :  { %493 = vmatmul.mubr.bf16.gmra.mxu1 %v1212_v43 }
  0x86   :  { %502 = vmatprep.mubr.bf16.mxu1 %v1362_v0 }
  0x8d   :  { %503 = vmatmul.mubr.bf16.gmra.mxu1 %v1213_v44 }
  0x8e   :  { %1134 = vmatprep.mubr.msk.bf16.mxu1 %vm1364_vm0, %v1363_v45 }
 0x115   :  { %v434_v47 = vpop.f32.mrf.mxu1 }
 0x116   :  { %v435_v12 = vadd.f32 %v434_v47, %v1466_v57 }
 0x117   :  { %v436_v48 = vpop.f32.mrf.mxu1 }
 0x118   :  { %v1092_v58 = vpop.f32.mrf.mxu0  ;;  %v437_v8 = vadd.f32 %v436_v48, %v1468_v60 }
 0x119   :  { %v438_v50 = vpop.f32.mrf.mxu1  ;;  %v206_v48 = vadd.f32 %v1092_v58, %v1487_v16 }
 0x11a   :  { %v197_v3 = vpop.f32.mrf.mxu0  ;;  %v439_v9 = vadd.f32 %v438_v50, %v1466_v57 }
 0x11b   :  { %v440_v51 = vpop.f32.mrf.mxu1  ;;  %v198_v21 = vadd.f32 %v1487_v16, %v197_v3 }
 0x11c   :  { %v441_v5 = vadd.f32 %v440_v51, %v1468_v60  ;;  %v1093_v10 = vpop.f32.mrf.mxu0  ;;  %v513_v15 = vpack.c.bf16 %v439_v9, %v435_v12 }
 0x11d   :  { %v444_v54 = vpop.f32.mrf.mxu1  ;;  %v209_v49 = vadd.f32 %v1093_v10, %v1487_v16 }
 0x11e   :  { %v445_v61 = vadd.f32 %v444_v54, %v1466_v57  ;;  %v521_v13 = vpack.c.bf16 %v441_v5, %v437_v8  ;;  %v200_v17 = vpop.f32.mrf.mxu0 }
 0x11f   :  { %v446_v56 = vpop.f32.mrf.mxu1  ;;  %v201_v22 = vadd.f32 %v1487_v16, %v200_v17 }
 0x120   :  { %v447_v0 = vadd.f32 %v446_v56, %v1468_v60  ;;  %v1096_v52 = vpop.f32.mrf.mxu0  ;;  %v530_v56 = vpack.c.bf16 %v209_v49, %v206_v48 }
 0x121   :  { %v448_v59 = vpop.f32.mrf.mxu1  ;;  %v529_v27 = vpack.c.bf16 %v201_v22, %v198_v21 }
 0x122   :  { %v449_v62 = vadd.f32 %v448_v59, %v1466_v57  ;;  %v213_v58 = vpop.f32.mrf.mxu0 }
 0x123   :  { %v450_v63 = vpop.f32.mrf.mxu1 }
 0x124   :  { %v514_v1 = vpack.c.bf16 %v449_v62, %v445_v61  ;;  %v451_v2 = vadd.f32 %v450_v63, %v1468_v60 }
 0x125   :  { %v454_v4 = vpop.f32.mrf.mxu1 }
 0x126   :  { %v522_v6 = vpack.c.bf16 %v451_v2, %v447_v0  ;;  %1099 = vmatpush3.bf16.xpose.msra.mxu0 %v514_v1  ;;  %v455_v41 = vadd.f32 %v454_v4, %v1466_v57  ;;  %v1097_v4 = vpop.f32.mrf.mxu0 }
 0x127   :  { %v1475_v7 = vpop.f32.mrf.mxu1  ;;  %1100 = vmatprep.subr.bf16.mxu0 %v1363_v45 }
 0x128   :  { %1131 = vmatpush3.bf16.msra.mxu1 %v522_v6  ;;  %v216_v10 = vpop.f32.mrf.mxu0 }
 0x129   :  { %v458_v11 = vpop.f32.mrf.mxu1  ;;  %1132 = vmatprep.subr.bf16.mxu1 %v1363_v45  ;;  %v217_v17 = vadd.f32 %v1487_v16, %v216_v10 }
 0x12a   :  { %v459_v38 = vadd.f32 %v458_v11, %v1466_v57 }
 0x12b   :  { %v1482_v14 = vpop.f32.mrf.mxu1 }
 0x12c   :  { %1133 = vmatpush3.bf16.msra.mxu1 %v521_v13  ;;  %v515_v43 = vpack.c.bf16 %v459_v38, %v455_v41 }
 0x12d   :  { %v464_v18 = vpop.f32.mrf.mxu1  ;;  %1146 = vmatprep.subr.bf16.mxu1 %v1363_v45 }
 0x12e   :  { %1101 = vmatpush3.bf16.xpose.msra.mxu0 %v513_v15  ;;  %v465_v25 = vadd.f32 %v464_v18, %v1466_v57  ;;  %v214_v15 = vadd.f32 %v1487_v16, %v213_v58 }
 0x12f   :  { %v1492_v23 = vpop.f32.mrf.mxu1  ;;  %1106 = vmatprep.subr.bf16.mxu0 %v1363_v45 }
 0x130   :  { %v467_v48 = vadd.f32 %v1492_v23, %v1468_v60 }
 0x131   :  { %v468_v24 = vpop.f32.mrf.mxu1 }
 0x132   :  { %v469_v26 = vadd.f32 %v468_v24, %v1466_v57 }
 0x133   :  { %v1497_v28 = vpop.f32.mrf.mxu1 }
 0x134   :  { %v516_v33 = vpack.c.bf16 %v469_v26, %v465_v25  ;;  %v531_v26 = vpack.c.bf16 %v217_v17, %v214_v15 }
 0x135   :  { %v474_v34 = vpop.f32.mrf.mxu1  ;;  %1103 = vmatmul.mubr.bf16.vlgmr.msra.gmra.mxu0 %v529_v27 }
 0x136   :  { %1107 = vmatpush3.bf16.xpose.msra.mxu0 %v516_v33  ;;  %1110 = vmatprep.mubr.msk.bf16.mxu0 %vm1364_vm0, %v1363_v45  ;;  %v475_v6 = vadd.f32 %v474_v34, %v1466_v57 }
 0x137   :  { %v476_v35 = vpop.f32.mrf.mxu1  ;;  %1108 = vmatprep.subr.bf16.mxu0 %v1363_v45 }
 0x138   :  { %v1504_v39 = vadd.f32 %v476_v35, %v1468_v60 }
 0x139   :  { %v478_v40 = vpop.f32.mrf.mxu1 }
 0x13a   :  { %v479_v2 = vadd.f32 %v478_v40, %v1466_v57 }
 0x13b   :  { %v480_v42 = vpop.f32.mrf.mxu1 }
 0x13c   :  { %v1508_v44 = vadd.f32 %v480_v42, %v1468_v60  ;;  %v517_v9 = vpack.c.bf16 %v479_v2, %v475_v6  ;;  %v222_v42 = vadd.f32 %v1096_v52, %v1487_v16 }
 0x13d   :  { %v484_v46 = vpop.f32.mrf.mxu1 }
 0x13e   :  { %v525_v47 = vpack.c.bf16 %v1508_v44, %v1504_v39  ;;  %1109 = vmatpush3.bf16.xpose.msra.mxu0 %v515_v43  ;;  %v485_v54 = vadd.f32 %v484_v46, %v1466_v57  ;;  %v225_v43 = vadd.f32 %v1097_v4, %v1487_v16  ;;  %v471_v46 = vadd.f32 %v1497_v28, %v1468_v60 }
 0x13f   :  { %v486_v50 = vpop.f32.mrf.mxu1  ;;  %1114 = vmatprep.subr.bf16.mxu0 %v1363_v45 }
 0x140   :  { %v1516_v51 = vadd.f32 %v486_v50, %v1468_v60  ;;  %v532_v49 = vpack.c.bf16 %v225_v43, %v222_v42  ;;  %v461_v50 = vadd.f32 %v1482_v14, %v1468_v60 }
 0x141   :  { %v488_v53 = vpop.f32.mrf.mxu1 }
 0x142   :  { %v489_v55 = vadd.f32 %v488_v53, %v1466_v57  ;;  %v524_v53 = vpack.c.bf16 %v471_v46, %v467_v48 }
 0x143   :  { %v490_v59 = vpop.f32.mrf.mxu1 }
 0x144   :  { %v518_v61 = vpack.c.bf16 %v489_v55, %v485_v54  ;;  %v1521_v62 = vadd.f32 %v490_v59, %v1468_v60 }
 0x145   :  { %v494_v63 = vpop.f32.mrf.mxu1  ;;  %1111 = vmatmul.mubr.bf16.vlgmr.msra.gmra.mxu0 %v530_v56 }
 0x146   :  { %v526_v0 = vpack.c.bf16 %v1521_v62, %v1516_v51  ;;  %1115 = vmatpush3.bf16.xpose.msra.mxu0 %v518_v61  ;;  %1118 = vmatprep.mubr.msk.bf16.mxu0 %vm1364_vm0, %v1363_v45  ;;  %v495_v40 = vadd.f32 %v494_v63, %v1466_v57 }
 0x147   :  { %v496_v1 = vpop.f32.mrf.mxu1  ;;  %1116 = vmatprep.subr.bf16.mxu0 %v1363_v45 }
 0x148   :  { %v1530_v3 = vadd.f32 %v496_v1, %v1468_v60 }
 0x149   :  { %v498_v5 = vpop.f32.mrf.mxu1 }
 0x14a   :  { %v499_v38 = vadd.f32 %v498_v5, %v1466_v57 }
 0x14b   :  { %v500_v8 = vpop.f32.mrf.mxu1 }
 0x14c   :  { %v1534_v11 = vadd.f32 %v500_v8, %v1468_v60  ;;  %v519_v41 = vpack.c.bf16 %v499_v38, %v495_v40 }
 0x14d   :  { %v504_v12 = vpop.f32.mrf.mxu1 }
 0x14e   :  { %v527_v13 = vpack.c.bf16 %v1534_v11, %v1530_v3  ;;  %1117 = vmatpush3.bf16.xpose.msra.mxu0 %v517_v9  ;;  %v505_v24 = vadd.f32 %v504_v12, %v1466_v57 }
 0x14f   :  { %v506_v18 = vpop.f32.mrf.mxu1  ;;  %1122 = vmatprep.subr.bf16.mxu0 %v1363_v45 }
 0x150   :  { %v1542_v21 = vadd.f32 %v506_v18, %v1468_v60 }
 0x151   :  { %v508_v22 = vpop.f32.mrf.mxu1 }
 0x152   :  { %v509_v25 = vadd.f32 %v508_v22, %v1466_v57  ;;  %v457_v57 = vadd.f32 %v1475_v7, %v1468_v60 }
 0x153   :  { %v510_v27 = vpop.f32.mrf.mxu1 }
 0x154   :  { %v520_v33 = vpack.c.bf16 %v509_v25, %v505_v24  ;;  %v1547_v34 = vadd.f32 %v510_v27, %v1468_v60  ;;  %v523_v16 = vpack.c.bf16 %v461_v50, %v457_v57 }
 0x155   :  { %1119 = vmatmul.mubr.bf16.vlgmr.msra.gmra.mxu0 %v531_v26 }
 0x156   :  { %v528_v35 = vpack.c.bf16 %v1547_v34, %v1542_v21  ;;  %1123 = vmatpush3.bf16.xpose.msra.mxu0 %v520_v33  ;;  %1126 = vmatprep.mubr.msk.bf16.mxu0 %vm1364_vm0, %v1363_v45 }
 0x157   :  { %1124 = vmatprep.subr.bf16.mxu0 %v1363_v45 }
 0x15e   :  { %1125 = vmatpush3.bf16.xpose.msra.mxu0 %v519_v41 }
 0x15f   :  { %1138 = vmatprep.subr.bf16.mxu0 %v1363_v45 }
 0x165   :  { %1127 = vmatmul.mubr.bf16.vlgmr.msra.gmra.mxu0 %v532_v49 }
 0x166   :  { %1139 = vmatpush3.bf16.msra.mxu0 %v524_v53  ;;  %1142 = vmatprep.mubr.msk.bf16.mxu0 %vm1364_vm0, %v1363_v45 }
 0x167   :  { %1140 = vmatprep.subr.bf16.mxu0 %v1363_v45 }
 0x16a   :  { %1141 = vmatpush3.bf16.msra.mxu0 %v523_v16 }
 0x16b   :  { %1154 = vmatprep.subr.bf16.mxu0 %v1363_v45 }
 0x1f5   :  { %v567_v23 = vpop.f32.mrf.mxu0 }
 0x1f6   :  { %v698_v28 = vsel %vm697_vm1, %v567_v23, -inf }
 0x1f7   :  { %699 = vmax.xlane.f32.xlu0 %v698_v28  ;;  %v1104_v14 = vpop.f32.mrf.mxu0 }
 0x1f9   :  { %v570_v52 = vpop.f32.mrf.mxu0 }
 0x1fa   :  { %v701_v54 = vsel %vm697_vm1, %v570_v52, -inf }
 0x1fb   :  { %702 = vmax.xlane.f32.xlu0 %v701_v54  ;;  %v1105_v60 = vpop.f32.mrf.mxu0 }
 0x205   :  { %v608_v7 = vpop.f32.mrf.mxu0 }
 0x206   :  { %v704_v55 = vsel %vm697_vm1, %v608_v7, -inf }
 0x207   :  { %705 = vmax.xlane.f32.xlu1 %v704_v55  ;;  %v1112_v56 = vpop.f32.mrf.mxu0 }
 0x209   :  { %v611_v59 = vpop.f32.mrf.mxu0 }
 0x20a   :  { %v707_v61 = vsel %vm697_vm1, %v611_v59, -inf }
 0x20b   :  { %708 = vmax.xlane.f32.xlu1 %v707_v61  ;;  %v1113_v58 = vpop.f32.mrf.mxu0 }
 0x215   :  { %v649_v63 = vpop.f32.mrf.mxu0 }
 0x216   :  { %v710_v1 = vsel %vm697_vm1, %v649_v63, -inf }
 0x217   :  { %711 = vmax.xlane.f32.xlu0 %v710_v1  ;;  %v1120_v2 = vpop.f32.mrf.mxu0 }
 0x219   :  { %v652_v4 = vpop.f32.mrf.mxu0 }
 0x21a   :  { %v713_v5 = vsel %vm697_vm1, %v652_v4, -inf }
 0x21b   :  { %714 = vmax.xlane.f32.xlu1 %v713_v5  ;;  %v1121_v6 = vpop.f32.mrf.mxu0 }
 0x225   :  { %v690_v8 = vpop.f32.mrf.mxu0 }
 0x226   :  { %v716_v9 = vsel %vm697_vm1, %v690_v8, -inf }
 0x227   :  { %717 = vmax.xlane.f32.xlu0 %v716_v9  ;;  %v1128_v10 = vpop.f32.mrf.mxu0 }
 0x229   :  { %v693_v12 = vpop.f32.mrf.mxu0 }
 0x22a   :  { %v719_v15 = vsel %vm697_vm1, %v693_v12, -inf }
 0x22b   :  { %720 = vmax.xlane.f32.xlu1 %v719_v15  ;;  %v1129_v17 = vpop.f32.mrf.mxu0 }
 0x280   :  { %v700_v18 = vpop.xlane.xlu0 %699 }
 0x281   :  { %v722_v22 = vsub.f32 %v567_v23, %v700_v18 }
 0x283   :  { %v730_v24 = vmul.f32 1.442695, %v722_v22 }
 0x284   :  { %v703_v25 = vpop.xlane.xlu0 %702 }
 0x285   :  { %1214 = vpow2.f32 %v730_v24  ;;  %v723_v26 = vsub.f32 %v570_v52, %v703_v25 }
 0x287   :  { %v732_v27 = vmul.f32 1.442695, %v723_v26 }
 0x289   :  { %1216 = vpow2.f32 %v732_v27 }
 0x290   :  { %v706_v33 = vpop.xlane.xlu1 %705 }
 0x291   :  { %v724_v38 = vsub.f32 %v608_v7, %v706_v33 }
 0x292   :  { %v1215_v40 = vpop.eup %1214 }
 0x293   :  { %v734_v41 = vmul.f32 1.442695, %v724_v38  ;;  %v746_v42 = vsel %vm697_vm1, %v1215_v40, 0.0 }
 0x294   :  { %v709_v43 = vpop.xlane.xlu1 %708  ;;  %747 = vadd.xlane.f32.xlu0 %v746_v42 }
 0x295   :  { %1218 = vpow2.f32 %v734_v41  ;;  %v725_v46 = vsub.f32 %v611_v59, %v709_v43 }
 0x296   :  { %v1217_v48 = vpop.eup %1216 }
 0x297   :  { %v770_v49 = vpack.c.bf16 %v1217_v48, %v1215_v40  ;;  %v736_v50 = vmul.f32 1.442695, %v725_v46  ;;  %v749_v53 = vsel %vm697_vm1, %v1217_v48, 0.0 }
 0x298   :  { %750 = vadd.xlane.f32.xlu1 %v749_v53 }
 0x299   :  { %1220 = vpow2.f32 %v736_v50  ;;  %1135 = vmatmul.mubr.msk.bf16.vlgmr.msra.gmra.mxu1 %vm697_vm1, %v770_v49 }
 0x29a   :  { %1147 = vmatpush3.bf16.msra.mxu1 %v526_v0  ;;  %1150 = vmatprep.mubr.msk.bf16.mxu1 %vm1364_vm0, %v1363_v45 }
 0x29b   :  { %1148 = vmatprep.subr.bf16.mxu1 %v1363_v45 }
 0x29e   :  { %1149 = vmatpush3.bf16.msra.mxu1 %v525_v47 }
 0x2a0   :  { %v712_v57 = vpop.xlane.xlu0 %711 }
 0x2a1   :  { %v726_v16 = vsub.f32 %v649_v63, %v712_v57 }
 0x2a2   :  { %v1219_v23 = vpop.eup %1218 }
 0x2a3   :  { %v738_v28 = vmul.f32 1.442695, %v726_v16  ;;  %v752_v14 = vsel %vm697_vm1, %v1219_v23, 0.0 }
 0x2a4   :  { %v715_v52 = vpop.xlane.xlu1 %714  ;;  %753 = vadd.xlane.f32.xlu0 %v752_v14 }
 0x2a5   :  { %1222 = vpow2.f32 %v738_v28  ;;  %v727_v51 = vsub.f32 %v652_v4, %v715_v52 }
 0x2a6   :  { %v1221_v62 = vpop.eup %1220 }
 0x2a7   :  { %v740_v0 = vmul.f32 1.442695, %v727_v51  ;;  %v755_v54 = vsel %vm697_vm1, %v1221_v62, 0.0  ;;  %v771_v60 = vpack.c.bf16 %v1221_v62, %v1219_v23 }
 0x2a8   :  { %756 = vadd.xlane.f32.xlu1 %v755_v54 }
 0x2a9   :  { %1224 = vpow2.f32 %v740_v0  ;;  %1143 = vmatmul.mubr.msk.bf16.vlgmr.msra.gmra.mxu0 %vm697_vm1, %v771_v60 }
 0x2aa   :  { %1155 = vmatpush3.bf16.msra.mxu0 %v528_v35  ;;  %1158 = vmatprep.mubr.msk.bf16.mxu0 %vm1364_vm0, %v1363_v45 }
 0x2ab   :  { %1156 = vmatprep.subr.bf16.mxu0 %v1363_v45 }
 0x2ae   :  { %1157 = vmatpush3.bf16.msra.mxu0 %v527_v13 }
 0x2b0   :  { %v718_v39 = vpop.xlane.xlu0 %717 }
 0x2b1   :  { %v728_v44 = vsub.f32 %v690_v8, %v718_v39 }
 0x2b2   :  { %v1223_v47 = vpop.eup %1222 }
 0x2b3   :  { %v742_v7 = vmul.f32 1.442695, %v728_v44  ;;  %v758_v55 = vsel %vm697_vm1, %v1223_v47, 0.0 }
 0x2b4   :  { %759 = vadd.xlane.f32.xlu0 %v758_v55  ;;  %v721_v56 = vpop.xlane.xlu1 %720 }
 0x2b5   :  { %1226 = vpow2.f32 %v742_v7  ;;  %v729_v21 = vsub.f32 %v693_v12, %v721_v56 }
 0x2b6   :  { %v1225_v34 = vpop.eup %1224 }
 0x2b7   :  { %v744_v35 = vmul.f32 1.442695, %v729_v21  ;;  %v761_v59 = vsel %vm697_vm1, %v1225_v34, 0.0  ;;  %v772_v61 = vpack.c.bf16 %v1225_v34, %v1223_v47 }
 0x2b8   :  { %762 = vadd.xlane.f32.xlu1 %v761_v59 }
 0x2b9   :  { %1228 = vpow2.f32 %v744_v35  ;;  %1151 = vmatmul.mubr.msk.bf16.vlgmr.msra.gmra.mxu1 %vm697_vm1, %v772_v61 }
 0x2c2   :  { %v1227_v45 = vpop.eup %1226 }
 0x2c3   :  { %v764_v3 = vsel %vm697_vm1, %v1227_v45, 0.0 }
 0x2c4   :  { %765 = vadd.xlane.f32.xlu0 %v764_v3 }
 0x2c6   :  { %v1229_v11 = vpop.eup %1228 }
 0x2c7   :  { %v767_v13 = vsel %vm697_vm1, %v1229_v11, 0.0  ;;  %v773_v58 = vpack.c.bf16 %v1229_v11, %v1227_v45 }
 0x2c8   :  { %768 = vadd.xlane.f32.xlu1 %v767_v13 }
 0x2c9   :  { %1159 = vmatmul.mubr.msk.bf16.vlgmr.msra.gmra.mxu0 %vm697_vm1, %v773_v58 }
 0x31d   :  { %v748_v63 = vpop.xlane.xlu0 %747 }
 0x31e   :  { %1230 = vrcp.f32 %v748_v63 }
 0x321   :  { %v751_v1 = vpop.xlane.xlu1 %750 }
 0x322   :  { %1232 = vrcp.f32 %v751_v1 }
 0x32b   :  { %v1231_v2 = vpop.eup %1230 }
 0x32d   :  { %v754_v4 = vpop.xlane.xlu0 %753 }
 0x32e   :  { %1234 = vrcp.f32 %v754_v4 }
 0x32f   :  { %v1233_v10 = vpop.eup %1232 }
 0x331   :  { %v757_v12 = vpop.xlane.xlu1 %756 }
 0x332   :  { %1236 = vrcp.f32 %v757_v12 }
 0x33b   :  { %v1235_v24 = vpop.eup %1234 }
 0x33d   :  { %v760_v25 = vpop.xlane.xlu0 %759 }
 0x33e   :  { %1238 = vrcp.f32 %v760_v25 }
 0x33f   :  { %v1237_v40 = vpop.eup %1236 }
 0x34d   :  { %v766_v48 = vpop.xlane.xlu0 %765 }
 0x359   :  { %v811_v5 = vpop.f32.mrf.mxu1 }
 0x35a   :  { %v958_v6 = vmul.f32 %v1231_v2, %v811_v5 }
 0x35b   :  { %v1136_v8 = vpop.f32.mrf.mxu1 }
 0x35c   :  { %v966_v9 = vadd.f32 %v958_v6, %v1426_v19  ;;  %v763_v19 = vpop.xlane.xlu1 %762 }
 0x35d   :  { %v814_v15 = vpop.f32.mrf.mxu1  ;;  %1240 = vrcp.f32 %v763_v19 }
 0x35e   :  { %974 = vst [vmem:[#allocation10] sm:$0xff] %v966_v9  ;;  %v959_v17 = vmul.f32 %v1233_v10, %v814_v15  ;;  %1242 = vrcp.f32 %v766_v48 }
 0x35f   :  { %v1137_v18 = vpop.f32.mrf.mxu1 }
 0x360   :  { %v967_v22 = vadd.f32 %v959_v17, %v1428_v20  ;;  %v1239_v20 = vpop.eup %1238 }
 0x362   :  { %975 = vst [vmem:[#allocation10 + $0x8] sm:$0xff] %v967_v22 }
 0x369   :  { %v855_v26 = vpop.f32.mrf.mxu0 }
 0x36a   :  { %v960_v27 = vmul.f32 %v1235_v24, %v855_v26  ;;  %v1241_v16 = vpop.eup %1240 }
 0x36b   :  { %v1144_v33 = vpop.f32.mrf.mxu0 }
 0x36c   :  { %v968_v38 = vadd.f32 %v960_v27, %v1432_v29  ;;  %v769_v29 = vpop.xlane.xlu1 %768 }
 0x36d   :  { %v858_v41 = vpop.f32.mrf.mxu0  ;;  %1244 = vrcp.f32 %v769_v29 }
 0x36e   :  { %976 = vst [vmem:[#allocation10 + $0x10] sm:$0xff] %v968_v38  ;;  %v961_v42 = vmul.f32 %v1237_v40, %v858_v41 }
 0x36f   :  { %v1145_v43 = vpop.f32.mrf.mxu0 }
 0x370   :  { %v969_v46 = vadd.f32 %v961_v42, %v1434_v30  ;;  %v1243_v30 = vpop.eup %1242 }
 0x372   :  { %977 = vst [vmem:[#allocation10 + $0x18] sm:$0xff] %v969_v46 }
 0x379   :  { %v899_v49 = vpop.f32.mrf.mxu1 }
 0x37a   :  { %v962_v50 = vmul.f32 %v1239_v20, %v899_v49  ;;  %v1245_v60 = vpop.eup %1244 }
 0x37b   :  { %v1152_v53 = vpop.f32.mrf.mxu1 }
 0x37c   :  { %v970_v57 = vadd.f32 %v962_v50, %v1436_v31 }
 0x37d   :  { %v902_v23 = vpop.f32.mrf.mxu1 }
 0x37e   :  { %978 = vst [vmem:[#allocation10 + $0x20] sm:$0xff] %v970_v57  ;;  %v963_v28 = vmul.f32 %v1241_v16, %v902_v23 }
 0x37f   :  { %v1153_v14 = vpop.f32.mrf.mxu1 }
 0x380   :  { %v971_v52 = vadd.f32 %v963_v28, %v1438_v32 }
 0x382   :  { %979 = vst [vmem:[#allocation10 + $0x28] sm:$0xff] %v971_v52 }
 0x389   :  { %v943_v51 = vpop.f32.mrf.mxu0 }
 0x38a   :  { %v964_v62 = vmul.f32 %v1243_v30, %v943_v51 }
 0x38b   :  { %v1160_v0 = vpop.f32.mrf.mxu0 }
 0x38c   :  { %v972_v54 = vadd.f32 %v964_v62, %v1445_v36 }
 0x38d   :  { %v946_v39 = vpop.f32.mrf.mxu0 }
 0x38e   :  { %980 = vst [vmem:[#allocation10 + $0x30] sm:$0xff] %v972_v54  ;;  %v965_v31 = vmul.f32 %v1245_v60, %v946_v39 }
 0x38f   :  { %v1161_v44 = vpop.f32.mrf.mxu0 }
 0x390   :  { %v973_v47 = vadd.f32 %v965_v31, %v1447_v37 }
 0x392   :  { %981 = vst [vmem:[#allocation10 + $0x38] sm:$0xff] %v973_v47 }
 0x393   :  { %1337 = shalt.err (!%p1334_p10)
}
 0x394   :  { %993 = dma.vmem_to_hbm [thread:$0]  %s988_s20, 1024, %s1629_s6, [#allocation4], %s1358_s7, %s1358_s7, %s1359_s8  }
 0x395   :  { %1352 = dma.done.wait [#allocation4], 1024  }
 0x396   :  { %1353 = vsyncadd [#allocation4], 4294966272 }
 0x397   :  { %997 = vsyncpa [#allocation3], 1 }
 0x398   :  { %998 = vsyncpa [#allocation6], 1 }
 0x399   :  { %999 = vsyncpa [#allocation9], 1 }
 0x39a   :  { %1000 = vsyncpa [#allocation4], 1 }

</bundles_post_ra>
